<compile_context>
chip_gen: v7x
topology: tpu7x:2x2x1
jax: 0.10.0
libtpu: 0.0.40
codegen_flags: <defaults>
</compile_context>

<pallas_src>
import functools

import numpy as np
import jax
import jax.numpy as jnp
from jax.experimental import pallas as pl
from jax.experimental.pallas import tpu as pltpu


# ----------------------- host-side parameter packing ----------------------- #

def _pack_conv_layer(w, b, hin, win, stride, pad):
    """Fold a PyTorch-layout Conv2d into per-kernel-row (R, A) matmul operands.

    w : (Cout, Cin, KH, KW) float32  (PyTorch OIHW), b : (Cout,) or None.
    Per-sample layer input  H = (hin, win*Cin)   with lane index  x*Cin + c
    Per-sample layer output O = (oh,  ow*Cout)   with lane index ow*Cout + o
    and the conv is   O = sum_ky (R[ky] @ H) @ A[ky]  (+ bias row).
    """
    cout, cin, kh, kw = w.shape
    oh = (hin + 2 * pad - kh) // stride + 1
    ow = (win + 2 * pad - kw) // stride + 1

    w_np = np.asarray(w, np.float32)
    r = np.zeros((kh, oh, hin), np.float32)
    a = np.zeros((kh, win * cin, ow * cout), np.float32)
    for ky in range(kh):
        for i in range(oh):
            y = stride * i + ky - pad
            if 0 <= y < hin:                      # out-of-range rows = zero padding
                r[ky, i, y] = 1.0
        for j in range(ow):
            for kx in range(kw):
                x = stride * j + kx - pad
                if 0 <= x < win:                  # out-of-range cols = zero padding
                    a[ky, x * cin:(x + 1) * cin, j * cout:(j + 1) * cout] = \
                        w_np[:, :, ky, kx].T      # (Cin, Cout) tap block
    packed = {
        "r": jnp.asarray(r, jnp.bfloat16),
        "a": jnp.asarray(a, jnp.bfloat16),
        "oh": oh, "ow": ow, "cout": cout,
    }
    if b is not None:
        bias_row = np.tile(np.asarray(b, np.float32), ow).reshape(1, ow * cout)
        packed["bias"] = jnp.asarray(bias_row, jnp.float32)
    return packed


def init_discriminator_params(key, image_size=16, conv_dim=8, c_dim=5, repeat_num=3):
    params = {"main": []}
    scale = 0.05
    in_ch = 3
    curr = conv_dim
    for _ in range(repeat_num):
        key, kw_, kb_ = jax.random.split(key, 3)
        w = scale * jax.random.normal(kw_, (curr, in_ch, 4, 4), jnp.float32)
        b = scale * jax.random.normal(kb_, (curr,), jnp.float32)
        params["main"].append((w, b))
        in_ch = curr
        curr *= 2
    curr_dim = in_ch
    ksz = image_size // (2 ** repeat_num)
    key, k1, k2 = jax.random.split(key, 3)
    params["conv1_w"] = scale * jax.random.normal(k1, (1, curr_dim, 3, 3), jnp.float32)
    params["conv2_w"] = scale * jax.random.normal(
        k2, (c_dim, curr_dim, ksz, ksz), jnp.float32)
    return params


def prepare_discriminator(params, image_size=16):
    """One-time packing of all conv weights into fused-kernel matmul operands."""
    packed = {"main": [], "image_size": image_size}
    h = image_size
    for (wgt, bias) in params["main"]:
        packed["main"].append(_pack_conv_layer(wgt, bias, h, h, stride=2, pad=1))
        h //= 2
    packed["conv1"] = _pack_conv_layer(params["conv1_w"], None, h, h, stride=1, pad=1)
    packed["conv2"] = _pack_conv_layer(params["conv2_w"], None, h, h, stride=1, pad=0)
    return packed


# ------------------------------ fused kernel ------------------------------- #

def _fused_disc_kernel(x_ref,
                       r1, a1, b1, r2, a2, b2, r3, a3, b3,
                       r4, a4, r5, a5,
                       src_ref, cls_ref):
    def conv(h, r_ref, a_ref, bias_ref=None, leaky=False):
        acc = None
        for ky in range(r_ref.shape[0]):             # static unroll, KH <= 4
            sel = jnp.dot(r_ref[ky], h,
                          preferred_element_type=jnp.float32).astype(jnp.bfloat16)
            part = jnp.dot(sel, a_ref[ky],
                           preferred_element_type=jnp.float32)
            acc = part if acc is None else acc + part
        if bias_ref is not None:
            acc = acc + bias_ref[...]                  # (1, N) broadcast over rows
        if leaky:
            acc = jnp.where(acc >= 0, acc, jnp.float32(0.01) * acc)
        return acc

    h = x_ref[0]                                       # (H, W*3) bf16, this sample
    h = conv(h, r1, a1, b1, leaky=True).astype(jnp.bfloat16)
    h = conv(h, r2, a2, b2, leaky=True).astype(jnp.bfloat16)
    h = conv(h, r3, a3, b3, leaky=True).astype(jnp.bfloat16)
    src_ref[0] = conv(h, r4, a4)                       # (OH, OW) f32, Cout == 1
    cls_ref[0] = conv(h, r5, a5)                       # (1, c_dim) f32


def discriminator_forward(packed, x):
    B = x.shape[0]
    img = packed["image_size"]
    # Single boundary transpose NCHW -> (B, H, W*C), bf16 for the whole stack.
    x2 = jnp.transpose(x, (0, 2, 3, 1)).reshape(B, img, -1).astype(jnp.bfloat16)

    L1, L2, L3 = packed["main"]
    c1, c2 = packed["conv1"], packed["conv2"]

    def resident(arr):
        nd = arr.ndim
        return pl.BlockSpec(arr.shape, lambda b, nd=nd: (0,) * nd)

    in_arrays = [x2,
                 L1["r"], L1["a"], L1["bias"],
                 L2["r"], L2["a"], L2["bias"],
                 L3["r"], L3["a"], L3["bias"],
                 c1["r"], c1["a"], c2["r"], c2["a"]]
    in_specs = [pl.BlockSpec((1, x2.shape[1], x2.shape[2]), lambda b: (b, 0, 0))]
    in_specs += [resident(a) for a in in_arrays[1:]]

    src_shape = (B, c1["oh"], c1["ow"])                       # conv1 Cout == 1
    cls_shape = (B, c2["oh"], c2["ow"] * c2["cout"])          # (B, 1, c_dim)
    out_shape = (jax.ShapeDtypeStruct(src_shape, jnp.float32),
                 jax.ShapeDtypeStruct(cls_shape, jnp.float32))
    out_specs = (pl.BlockSpec((1,) + src_shape[1:], lambda b: (b, 0, 0)),
                 pl.BlockSpec((1,) + cls_shape[1:], lambda b: (b, 0, 0)))

    # Advisory cost estimate so XLA can schedule around the tiny fused call.
    flops = 0
    for lay in (L1, L2, L3, c1, c2):
        kh, oh, hin = lay["r"].shape
        _, kdim, ndim = lay["a"].shape
        flops += 2 * kh * (oh * hin * kdim + oh * kdim * ndim)
    flops *= B
    bytes_accessed = sum(int(np.prod(a.shape)) * a.dtype.itemsize for a in in_arrays)
    bytes_accessed += (int(np.prod(src_shape)) + int(np.prod(cls_shape))) * 4
    cost = pl.CostEstimate(flops=flops, transcendentals=0,
                           bytes_accessed=bytes_accessed)

    out_src, out_cls = pl.pallas_call(
        _fused_disc_kernel,
        out_shape=out_shape,
        grid=(B,),
        in_specs=in_specs,
        out_specs=out_specs,
        compiler_params=pltpu.CompilerParams(
            dimension_semantics=("parallel",)),
        cost_estimate=cost,
    )(*in_arrays)

    out_src = out_src.reshape(B, 1, c1["oh"], c1["ow"])       # NCHW head (Cout=1)
    out_cls = out_cls.reshape(B, c2["cout"])
    return out_src, out_cls


# ------------------------- pure-JAX reference check ------------------------ #

def _ref_conv(x, w, b, stride, pad):
    y = jax.lax.conv_general_dilated(
        x, w, window_strides=(stride, stride),
        padding=((pad, pad), (pad, pad)),
        dimension_numbers=("NCHW", "OIHW", "NCHW"))
    if b is not None:
        y = y + b.reshape(1, -1, 1, 1)
    return y


def _ref_forward(params, x):
    h = x
    for (w, b) in params["main"]:
        h = _ref_conv(h, w, b, 2, 1)
        h = jnp.where(h >= 0, h, 0.01 * h)
    out_src = _ref_conv(h, params["conv1_w"], None, 1, 1)
    out_cls = _ref_conv(h, params["conv2_w"], None, 1, 0)
    return out_src, out_cls.reshape(out_cls.shape[0], out_cls.shape[1])


# ---------------------------------- main ----------------------------------- #

if __name__ == "__main__":
    IMAGE_SIZE, CONV_DIM, C_DIM, REPEAT = 16, 8, 5, 3
    B = 2

    key = jax.random.PRNGKey(0)
    key, kx = jax.random.split(key)
    x = jax.random.normal(kx, (B, 3, IMAGE_SIZE, IMAGE_SIZE), jnp.float32)
    params = init_discriminator_params(key, IMAGE_SIZE, CONV_DIM, C_DIM, REPEAT)

    packed = prepare_discriminator(params, IMAGE_SIZE)   # one-time weight packing

    fwd = jax.jit(functools.partial(discriminator_forward, packed))
    out_src, out_cls = fwd(x)
    jax.block_until_ready((out_src, out_cls))

    assert out_src.shape == (B, 1, IMAGE_SIZE // 2 ** REPEAT, IMAGE_SIZE // 2 ** REPEAT)
    assert out_cls.shape == (B, C_DIM)

    ref_src, ref_cls = _ref_forward(params, x)
    assert jnp.allclose(out_src, ref_src, atol=2e-2, rtol=2e-2), \
        float(jnp.max(jnp.abs(out_src - ref_src)))
    assert jnp.allclose(out_cls, ref_cls, atol=2e-2, rtol=2e-2), \
        float(jnp.max(jnp.abs(out_cls - ref_cls)))

    print("KERNEL_OK")
</pallas_src>

<mosaic_0001>
module attributes {stable_mosaic.version = 11 : i64} {
  func.func @_fused_disc_kernel(%arg0: i32, %arg1: memref<1x16x48xbf16, #tpu.memory_space<vmem>>, %arg2: memref<4x8x16xbf16, #tpu.memory_space<vmem>>, %arg3: memref<4x48x64xbf16, #tpu.memory_space<vmem>>, %arg4: memref<1x64xf32, #tpu.memory_space<vmem>>, %arg5: memref<4x4x8xbf16, #tpu.memory_space<vmem>>, %arg6: memref<4x64x64xbf16, #tpu.memory_space<vmem>>, %arg7: memref<1x64xf32, #tpu.memory_space<vmem>>, %arg8: memref<4x2x4xbf16, #tpu.memory_space<vmem>>, %arg9: memref<4x64x64xbf16, #tpu.memory_space<vmem>>, %arg10: memref<1x64xf32, #tpu.memory_space<vmem>>, %arg11: memref<3x2x2xbf16, #tpu.memory_space<vmem>>, %arg12: memref<3x64x2xbf16, #tpu.memory_space<vmem>>, %arg13: memref<2x1x2xbf16, #tpu.memory_space<vmem>>, %arg14: memref<2x64x5xbf16, #tpu.memory_space<vmem>>, %arg15: memref<1x2x2xf32, #tpu.memory_space<vmem>>, %arg16: memref<1x1x5xf32, #tpu.memory_space<vmem>>) attributes {dimension_semantics = [#tpu.dimension_semantics<parallel>], iteration_bounds = array<i64: 2>, scalar_prefetch = 0 : i64, scratch_operands = 0 : i64, tpu.core_type = #tpu.core_type<tc>, window_params = [{transform_indices = @transform_0, window_bounds = array<i64: 1, 16, 48>}, {pipeline_mode = #tpu.pipeline_mode<synchronous>, transform_indices = @transform_1, window_bounds = array<i64: 4, 8, 16>}, {pipeline_mode = #tpu.pipeline_mode<synchronous>, transform_indices = @transform_2, window_bounds = array<i64: 4, 48, 64>}, {pipeline_mode = #tpu.pipeline_mode<synchronous>, transform_indices = @transform_3, window_bounds = array<i64: 1, 64>}, {pipeline_mode = #tpu.pipeline_mode<synchronous>, transform_indices = @transform_4, window_bounds = array<i64: 4, 4, 8>}, {pipeline_mode = #tpu.pipeline_mode<synchronous>, transform_indices = @transform_5, window_bounds = array<i64: 4, 64, 64>}, {pipeline_mode = #tpu.pipeline_mode<synchronous>, transform_indices = @transform_6, window_bounds = array<i64: 1, 64>}, {pipeline_mode = #tpu.pipeline_mode<synchronous>, transform_indices = @transform_7, window_bounds = array<i64: 4, 2, 4>}, {pipeline_mode = #tpu.pipeline_mode<synchronous>, transform_indices = @transform_8, window_bounds = array<i64: 4, 64, 64>}, {pipeline_mode = #tpu.pipeline_mode<synchronous>, transform_indices = @transform_9, window_bounds = array<i64: 1, 64>}, {pipeline_mode = #tpu.pipeline_mode<synchronous>, transform_indices = @transform_10, window_bounds = array<i64: 3, 2, 2>}, {pipeline_mode = #tpu.pipeline_mode<synchronous>, transform_indices = @transform_11, window_bounds = array<i64: 3, 64, 2>}, {pipeline_mode = #tpu.pipeline_mode<synchronous>, transform_indices = @transform_12, window_bounds = array<i64: 2, 1, 2>}, {pipeline_mode = #tpu.pipeline_mode<synchronous>, transform_indices = @transform_13, window_bounds = array<i64: 2, 64, 5>}, {transform_indices = @transform_14, window_bounds = array<i64: 1, 2, 2>}, {transform_indices = @transform_15, window_bounds = array<i64: 1, 1, 5>}]} {
    %c0 = arith.constant 0 : index
    %c0_0 = arith.constant 0 : index
    %c0_1 = arith.constant 0 : index
    %0 = vector.load %arg1[%c0, %c0_0, %c0_1] : memref<1x16x48xbf16, #tpu.memory_space<vmem>>, vector<1x16x48xbf16>
    %1 = vector.shape_cast %0 : vector<1x16x48xbf16> to vector<16x48xbf16>
    %c0_2 = arith.constant 0 : index
    %c0_3 = arith.constant 0 : index
    %c0_4 = arith.constant 0 : index
    %2 = vector.load %arg2[%c0_2, %c0_3, %c0_4] : memref<4x8x16xbf16, #tpu.memory_space<vmem>>, vector<1x8x16xbf16>
    %3 = vector.shape_cast %2 : vector<1x8x16xbf16> to vector<8x16xbf16>
    %cst = arith.constant dense<0.000000e+00> : vector<8x48xf32>
    %4 = tpu.matmul %3, %1, %cst {dimension_numbers = #tpu.dot_dimension_numbers<[1], [0], [0], [1], [0, 0, 1, 1], [], []>} : vector<8x16xbf16>, vector<16x48xbf16>, vector<8x48xf32> -> vector<8x48xf32>
    %5 = arith.truncf %4 : vector<8x48xf32> to vector<8x48xbf16>
    %c0_5 = arith.constant 0 : index
    %c0_6 = arith.constant 0 : index
    %c0_7 = arith.constant 0 : index
    %6 = vector.load %arg3[%c0_5, %c0_6, %c0_7] : memref<4x48x64xbf16, #tpu.memory_space<vmem>>, vector<1x48x64xbf16>
    %7 = vector.shape_cast %6 : vector<1x48x64xbf16> to vector<48x64xbf16>
    %cst_8 = arith.constant dense<0.000000e+00> : vector<8x64xf32>
    %8 = tpu.matmul %5, %7, %cst_8 {dimension_numbers = #tpu.dot_dimension_numbers<[1], [0], [0], [1], [0, 0, 1, 1], [], []>} : vector<8x48xbf16>, vector<48x64xbf16>, vector<8x64xf32> -> vector<8x64xf32>
    %c1 = arith.constant 1 : index
    %c0_9 = arith.constant 0 : index
    %c0_10 = arith.constant 0 : index
    %9 = vector.load %arg2[%c1, %c0_9, %c0_10] : memref<4x8x16xbf16, #tpu.memory_space<vmem>>, vector<1x8x16xbf16>
    %10 = vector.shape_cast %9 : vector<1x8x16xbf16> to vector<8x16xbf16>
    %cst_11 = arith.constant dense<0.000000e+00> : vector<8x48xf32>
    %11 = tpu.matmul %10, %1, %cst_11 {dimension_numbers = #tpu.dot_dimension_numbers<[1], [0], [0], [1], [0, 0, 1, 1], [], []>} : vector<8x16xbf16>, vector<16x48xbf16>, vector<8x48xf32> -> vector<8x48xf32>
    %12 = arith.truncf %11 : vector<8x48xf32> to vector<8x48xbf16>
    %c1_12 = arith.constant 1 : index
    %c0_13 = arith.constant 0 : index
    %c0_14 = arith.constant 0 : index
    %13 = vector.load %arg3[%c1_12, %c0_13, %c0_14] : memref<4x48x64xbf16, #tpu.memory_space<vmem>>, vector<1x48x64xbf16>
    %14 = vector.shape_cast %13 : vector<1x48x64xbf16> to vector<48x64xbf16>
    %cst_15 = arith.constant dense<0.000000e+00> : vector<8x64xf32>
    %15 = tpu.matmul %12, %14, %cst_15 {dimension_numbers = #tpu.dot_dimension_numbers<[1], [0], [0], [1], [0, 0, 1, 1], [], []>} : vector<8x48xbf16>, vector<48x64xbf16>, vector<8x64xf32> -> vector<8x64xf32>
    %16 = arith.addf %8, %15 : vector<8x64xf32>
    %c2 = arith.constant 2 : index
    %c0_16 = arith.constant 0 : index
    %c0_17 = arith.constant 0 : index
    %17 = vector.load %arg2[%c2, %c0_16, %c0_17] : memref<4x8x16xbf16, #tpu.memory_space<vmem>>, vector<1x8x16xbf16>
    %18 = vector.shape_cast %17 : vector<1x8x16xbf16> to vector<8x16xbf16>
    %cst_18 = arith.constant dense<0.000000e+00> : vector<8x48xf32>
    %19 = tpu.matmul %18, %1, %cst_18 {dimension_numbers = #tpu.dot_dimension_numbers<[1], [0], [0], [1], [0, 0, 1, 1], [], []>} : vector<8x16xbf16>, vector<16x48xbf16>, vector<8x48xf32> -> vector<8x48xf32>
    %20 = arith.truncf %19 : vector<8x48xf32> to vector<8x48xbf16>
    %c2_19 = arith.constant 2 : index
    %c0_20 = arith.constant 0 : index
    %c0_21 = arith.constant 0 : index
    %21 = vector.load %arg3[%c2_19, %c0_20, %c0_21] : memref<4x48x64xbf16, #tpu.memory_space<vmem>>, vector<1x48x64xbf16>
    %22 = vector.shape_cast %21 : vector<1x48x64xbf16> to vector<48x64xbf16>
    %cst_22 = arith.constant dense<0.000000e+00> : vector<8x64xf32>
    %23 = tpu.matmul %20, %22, %cst_22 {dimension_numbers = #tpu.dot_dimension_numbers<[1], [0], [0], [1], [0, 0, 1, 1], [], []>} : vector<8x48xbf16>, vector<48x64xbf16>, vector<8x64xf32> -> vector<8x64xf32>
    %24 = arith.addf %16, %23 : vector<8x64xf32>
    %c3 = arith.constant 3 : index
    %c0_23 = arith.constant 0 : index
    %c0_24 = arith.constant 0 : index
    %25 = vector.load %arg2[%c3, %c0_23, %c0_24] : memref<4x8x16xbf16, #tpu.memory_space<vmem>>, vector<1x8x16xbf16>
    %26 = vector.shape_cast %25 : vector<1x8x16xbf16> to vector<8x16xbf16>
    %cst_25 = arith.constant dense<0.000000e+00> : vector<8x48xf32>
    %27 = tpu.matmul %26, %1, %cst_25 {dimension_numbers = #tpu.dot_dimension_numbers<[1], [0], [0], [1], [0, 0, 1, 1], [], []>} : vector<8x16xbf16>, vector<16x48xbf16>, vector<8x48xf32> -> vector<8x48xf32>
    %28 = arith.truncf %27 : vector<8x48xf32> to vector<8x48xbf16>
    %c3_26 = arith.constant 3 : index
    %c0_27 = arith.constant 0 : index
    %c0_28 = arith.constant 0 : index
    %29 = vector.load %arg3[%c3_26, %c0_27, %c0_28] : memref<4x48x64xbf16, #tpu.memory_space<vmem>>, vector<1x48x64xbf16>
    %30 = vector.shape_cast %29 : vector<1x48x64xbf16> to vector<48x64xbf16>
    %cst_29 = arith.constant dense<0.000000e+00> : vector<8x64xf32>
    %31 = tpu.matmul %28, %30, %cst_29 {dimension_numbers = #tpu.dot_dimension_numbers<[1], [0], [0], [1], [0, 0, 1, 1], [], []>} : vector<8x48xbf16>, vector<48x64xbf16>, vector<8x64xf32> -> vector<8x64xf32>
    %32 = arith.addf %24, %31 : vector<8x64xf32>
    %c0_30 = arith.constant 0 : index
    %c0_31 = arith.constant 0 : index
    %33 = vector.load %arg4[%c0_30, %c0_31] : memref<1x64xf32, #tpu.memory_space<vmem>>, vector<1x64xf32>
    %34 = vector.broadcast %33 : vector<1x64xf32> to vector<8x64xf32>
    %35 = arith.addf %32, %34 : vector<8x64xf32>
    %cst_32 = arith.constant 0.000000e+00 : f32
    %36 = vector.broadcast %cst_32 : f32 to vector<8x64xf32>
    %37 = arith.cmpf oge, %35, %36 : vector<8x64xf32>
    %cst_33 = arith.constant 0.00999999977 : f32
    %38 = vector.broadcast %cst_33 : f32 to vector<8x64xf32>
    %39 = arith.mulf %38, %35 : vector<8x64xf32>
    %40 = arith.select %37, %35, %39 : vector<8x64xi1>, vector<8x64xf32>
    %41 = arith.truncf %40 : vector<8x64xf32> to vector<8x64xbf16>
    %c0_34 = arith.constant 0 : index
    %c0_35 = arith.constant 0 : index
    %c0_36 = arith.constant 0 : index
    %42 = vector.load %arg5[%c0_34, %c0_35, %c0_36] : memref<4x4x8xbf16, #tpu.memory_space<vmem>>, vector<1x4x8xbf16>
    %43 = vector.shape_cast %42 : vector<1x4x8xbf16> to vector<4x8xbf16>
    %cst_37 = arith.constant dense<0.000000e+00> : vector<4x64xf32>
    %44 = tpu.matmul %43, %41, %cst_37 {dimension_numbers = #tpu.dot_dimension_numbers<[1], [0], [0], [1], [0, 0, 1, 1], [], []>} : vector<4x8xbf16>, vector<8x64xbf16>, vector<4x64xf32> -> vector<4x64xf32>
    %45 = arith.truncf %44 : vector<4x64xf32> to vector<4x64xbf16>
    %c0_38 = arith.constant 0 : index
    %c0_39 = arith.constant 0 : index
    %c0_40 = arith.constant 0 : index
    %46 = vector.load %arg6[%c0_38, %c0_39, %c0_40] : memref<4x64x64xbf16, #tpu.memory_space<vmem>>, vector<1x64x64xbf16>
    %47 = vector.shape_cast %46 : vector<1x64x64xbf16> to vector<64x64xbf16>
    %cst_41 = arith.constant dense<0.000000e+00> : vector<4x64xf32>
    %48 = tpu.matmul %45, %47, %cst_41 {dimension_numbers = #tpu.dot_dimension_numbers<[1], [0], [0], [1], [0, 0, 1, 1], [], []>} : vector<4x64xbf16>, vector<64x64xbf16>, vector<4x64xf32> -> vector<4x64xf32>
    %c1_42 = arith.constant 1 : index
    %c0_43 = arith.constant 0 : index
    %c0_44 = arith.constant 0 : index
    %49 = vector.load %arg5[%c1_42, %c0_43, %c0_44] : memref<4x4x8xbf16, #tpu.memory_space<vmem>>, vector<1x4x8xbf16>
    %50 = vector.shape_cast %49 : vector<1x4x8xbf16> to vector<4x8xbf16>
    %cst_45 = arith.constant dense<0.000000e+00> : vector<4x64xf32>
    %51 = tpu.matmul %50, %41, %cst_45 {dimension_numbers = #tpu.dot_dimension_numbers<[1], [0], [0], [1], [0, 0, 1, 1], [], []>} : vector<4x8xbf16>, vector<8x64xbf16>, vector<4x64xf32> -> vector<4x64xf32>
    %52 = arith.truncf %51 : vector<4x64xf32> to vector<4x64xbf16>
    %c1_46 = arith.constant 1 : index
    %c0_47 = arith.constant 0 : index
    %c0_48 = arith.constant 0 : index
    %53 = vector.load %arg6[%c1_46, %c0_47, %c0_48] : memref<4x64x64xbf16, #tpu.memory_space<vmem>>, vector<1x64x64xbf16>
    %54 = vector.shape_cast %53 : vector<1x64x64xbf16> to vector<64x64xbf16>
    %cst_49 = arith.constant dense<0.000000e+00> : vector<4x64xf32>
    %55 = tpu.matmul %52, %54, %cst_49 {dimension_numbers = #tpu.dot_dimension_numbers<[1], [0], [0], [1], [0, 0, 1, 1], [], []>} : vector<4x64xbf16>, vector<64x64xbf16>, vector<4x64xf32> -> vector<4x64xf32>
    %56 = arith.addf %48, %55 : vector<4x64xf32>
    %c2_50 = arith.constant 2 : index
    %c0_51 = arith.constant 0 : index
    %c0_52 = arith.constant 0 : index
    %57 = vector.load %arg5[%c2_50, %c0_51, %c0_52] : memref<4x4x8xbf16, #tpu.memory_space<vmem>>, vector<1x4x8xbf16>
    %58 = vector.shape_cast %57 : vector<1x4x8xbf16> to vector<4x8xbf16>
    %cst_53 = arith.constant dense<0.000000e+00> : vector<4x64xf32>
    %59 = tpu.matmul %58, %41, %cst_53 {dimension_numbers = #tpu.dot_dimension_numbers<[1], [0], [0], [1], [0, 0, 1, 1], [], []>} : vector<4x8xbf16>, vector<8x64xbf16>, vector<4x64xf32> -> vector<4x64xf32>
    %60 = arith.truncf %59 : vector<4x64xf32> to vector<4x64xbf16>
    %c2_54 = arith.constant 2 : index
    %c0_55 = arith.constant 0 : index
    %c0_56 = arith.constant 0 : index
    %61 = vector.load %arg6[%c2_54, %c0_55, %c0_56] : memref<4x64x64xbf16, #tpu.memory_space<vmem>>, vector<1x64x64xbf16>
    %62 = vector.shape_cast %61 : vector<1x64x64xbf16> to vector<64x64xbf16>
    %cst_57 = arith.constant dense<0.000000e+00> : vector<4x64xf32>
    %63 = tpu.matmul %60, %62, %cst_57 {dimension_numbers = #tpu.dot_dimension_numbers<[1], [0], [0], [1], [0, 0, 1, 1], [], []>} : vector<4x64xbf16>, vector<64x64xbf16>, vector<4x64xf32> -> vector<4x64xf32>
    %64 = arith.addf %56, %63 : vector<4x64xf32>
    %c3_58 = arith.constant 3 : index
    %c0_59 = arith.constant 0 : index
    %c0_60 = arith.constant 0 : index
    %65 = vector.load %arg5[%c3_58, %c0_59, %c0_60] : memref<4x4x8xbf16, #tpu.memory_space<vmem>>, vector<1x4x8xbf16>
    %66 = vector.shape_cast %65 : vector<1x4x8xbf16> to vector<4x8xbf16>
    %cst_61 = arith.constant dense<0.000000e+00> : vector<4x64xf32>
    %67 = tpu.matmul %66, %41, %cst_61 {dimension_numbers = #tpu.dot_dimension_numbers<[1], [0], [0], [1], [0, 0, 1, 1], [], []>} : vector<4x8xbf16>, vector<8x64xbf16>, vector<4x64xf32> -> vector<4x64xf32>
    %68 = arith.truncf %67 : vector<4x64xf32> to vector<4x64xbf16>
    %c3_62 = arith.constant 3 : index
    %c0_63 = arith.constant 0 : index
    %c0_64 = arith.constant 0 : index
    %69 = vector.load %arg6[%c3_62, %c0_63, %c0_64] : memref<4x64x64xbf16, #tpu.memory_space<vmem>>, vector<1x64x64xbf16>
    %70 = vector.shape_cast %69 : vector<1x64x64xbf16> to vector<64x64xbf16>
    %cst_65 = arith.constant dense<0.000000e+00> : vector<4x64xf32>
    %71 = tpu.matmul %68, %70, %cst_65 {dimension_numbers = #tpu.dot_dimension_numbers<[1], [0], [0], [1], [0, 0, 1, 1], [], []>} : vector<4x64xbf16>, vector<64x64xbf16>, vector<4x64xf32> -> vector<4x64xf32>
    %72 = arith.addf %64, %71 : vector<4x64xf32>
    %c0_66 = arith.constant 0 : index
    %c0_67 = arith.constant 0 : index
    %73 = vector.load %arg7[%c0_66, %c0_67] : memref<1x64xf32, #tpu.memory_space<vmem>>, vector<1x64xf32>
    %74 = vector.broadcast %73 : vector<1x64xf32> to vector<4x64xf32>
    %75 = arith.addf %72, %74 : vector<4x64xf32>
    %cst_68 = arith.constant 0.000000e+00 : f32
    %76 = vector.broadcast %cst_68 : f32 to vector<4x64xf32>
    %77 = arith.cmpf oge, %75, %76 : vector<4x64xf32>
    %cst_69 = arith.constant 0.00999999977 : f32
    %78 = vector.broadcast %cst_69 : f32 to vector<4x64xf32>
    %79 = arith.mulf %78, %75 : vector<4x64xf32>
    %80 = arith.select %77, %75, %79 : vector<4x64xi1>, vector<4x64xf32>
    %81 = arith.truncf %80 : vector<4x64xf32> to vector<4x64xbf16>
    %c0_70 = arith.constant 0 : index
    %c0_71 = arith.constant 0 : index
    %c0_72 = arith.constant 0 : index
    %82 = vector.load %arg8[%c0_70, %c0_71, %c0_72] : memref<4x2x4xbf16, #tpu.memory_space<vmem>>, vector<1x2x4xbf16>
    %83 = vector.shape_cast %82 : vector<1x2x4xbf16> to vector<2x4xbf16>
    %cst_73 = arith.constant dense<0.000000e+00> : vector<2x64xf32>
    %84 = tpu.matmul %83, %81, %cst_73 {dimension_numbers = #tpu.dot_dimension_numbers<[1], [0], [0], [1], [0, 0, 1, 1], [], []>} : vector<2x4xbf16>, vector<4x64xbf16>, vector<2x64xf32> -> vector<2x64xf32>
    %85 = arith.truncf %84 : vector<2x64xf32> to vector<2x64xbf16>
    %c0_74 = arith.constant 0 : index
    %c0_75 = arith.constant 0 : index
    %c0_76 = arith.constant 0 : index
    %86 = vector.load %arg9[%c0_74, %c0_75, %c0_76] : memref<4x64x64xbf16, #tpu.memory_space<vmem>>, vector<1x64x64xbf16>
    %87 = vector.shape_cast %86 : vector<1x64x64xbf16> to vector<64x64xbf16>
    %cst_77 = arith.constant dense<0.000000e+00> : vector<2x64xf32>
    %88 = tpu.matmul %85, %87, %cst_77 {dimension_numbers = #tpu.dot_dimension_numbers<[1], [0], [0], [1], [0, 0, 1, 1], [], []>} : vector<2x64xbf16>, vector<64x64xbf16>, vector<2x64xf32> -> vector<2x64xf32>
    %c1_78 = arith.constant 1 : index
    %c0_79 = arith.constant 0 : index
    %c0_80 = arith.constant 0 : index
    %89 = vector.load %arg8[%c1_78, %c0_79, %c0_80] : memref<4x2x4xbf16, #tpu.memory_space<vmem>>, vector<1x2x4xbf16>
    %90 = vector.shape_cast %89 : vector<1x2x4xbf16> to vector<2x4xbf16>
    %cst_81 = arith.constant dense<0.000000e+00> : vector<2x64xf32>
    %91 = tpu.matmul %90, %81, %cst_81 {dimension_numbers = #tpu.dot_dimension_numbers<[1], [0], [0], [1], [0, 0, 1, 1], [], []>} : vector<2x4xbf16>, vector<4x64xbf16>, vector<2x64xf32> -> vector<2x64xf32>
    %92 = arith.truncf %91 : vector<2x64xf32> to vector<2x64xbf16>
    %c1_82 = arith.constant 1 : index
    %c0_83 = arith.constant 0 : index
    %c0_84 = arith.constant 0 : index
    %93 = vector.load %arg9[%c1_82, %c0_83, %c0_84] : memref<4x64x64xbf16, #tpu.memory_space<vmem>>, vector<1x64x64xbf16>
    %94 = vector.shape_cast %93 : vector<1x64x64xbf16> to vector<64x64xbf16>
    %cst_85 = arith.constant dense<0.000000e+00> : vector<2x64xf32>
    %95 = tpu.matmul %92, %94, %cst_85 {dimension_numbers = #tpu.dot_dimension_numbers<[1], [0], [0], [1], [0, 0, 1, 1], [], []>} : vector<2x64xbf16>, vector<64x64xbf16>, vector<2x64xf32> -> vector<2x64xf32>
    %96 = arith.addf %88, %95 : vector<2x64xf32>
    %c2_86 = arith.constant 2 : index
    %c0_87 = arith.constant 0 : index
    %c0_88 = arith.constant 0 : index
    %97 = vector.load %arg8[%c2_86, %c0_87, %c0_88] : memref<4x2x4xbf16, #tpu.memory_space<vmem>>, vector<1x2x4xbf16>
    %98 = vector.shape_cast %97 : vector<1x2x4xbf16> to vector<2x4xbf16>
    %cst_89 = arith.constant dense<0.000000e+00> : vector<2x64xf32>
    %99 = tpu.matmul %98, %81, %cst_89 {dimension_numbers = #tpu.dot_dimension_numbers<[1], [0], [0], [1], [0, 0, 1, 1], [], []>} : vector<2x4xbf16>, vector<4x64xbf16>, vector<2x64xf32> -> vector<2x64xf32>
    %100 = arith.truncf %99 : vector<2x64xf32> to vector<2x64xbf16>
    %c2_90 = arith.constant 2 : index
    %c0_91 = arith.constant 0 : index
    %c0_92 = arith.constant 0 : index
    %101 = vector.load %arg9[%c2_90, %c0_91, %c0_92] : memref<4x64x64xbf16, #tpu.memory_space<vmem>>, vector<1x64x64xbf16>
    %102 = vector.shape_cast %101 : vector<1x64x64xbf16> to vector<64x64xbf16>
    %cst_93 = arith.constant dense<0.000000e+00> : vector<2x64xf32>
    %103 = tpu.matmul %100, %102, %cst_93 {dimension_numbers = #tpu.dot_dimension_numbers<[1], [0], [0], [1], [0, 0, 1, 1], [], []>} : vector<2x64xbf16>, vector<64x64xbf16>, vector<2x64xf32> -> vector<2x64xf32>
    %104 = arith.addf %96, %103 : vector<2x64xf32>
    %c3_94 = arith.constant 3 : index
    %c0_95 = arith.constant 0 : index
    %c0_96 = arith.constant 0 : index
    %105 = vector.load %arg8[%c3_94, %c0_95, %c0_96] : memref<4x2x4xbf16, #tpu.memory_space<vmem>>, vector<1x2x4xbf16>
    %106 = vector.shape_cast %105 : vector<1x2x4xbf16> to vector<2x4xbf16>
    %cst_97 = arith.constant dense<0.000000e+00> : vector<2x64xf32>
    %107 = tpu.matmul %106, %81, %cst_97 {dimension_numbers = #tpu.dot_dimension_numbers<[1], [0], [0], [1], [0, 0, 1, 1], [], []>} : vector<2x4xbf16>, vector<4x64xbf16>, vector<2x64xf32> -> vector<2x64xf32>
    %108 = arith.truncf %107 : vector<2x64xf32> to vector<2x64xbf16>
    %c3_98 = arith.constant 3 : index
    %c0_99 = arith.constant 0 : index
    %c0_100 = arith.constant 0 : index
    %109 = vector.load %arg9[%c3_98, %c0_99, %c0_100] : memref<4x64x64xbf16, #tpu.memory_space<vmem>>, vector<1x64x64xbf16>
    %110 = vector.shape_cast %109 : vector<1x64x64xbf16> to vector<64x64xbf16>
    %cst_101 = arith.constant dense<0.000000e+00> : vector<2x64xf32>
    %111 = tpu.matmul %108, %110, %cst_101 {dimension_numbers = #tpu.dot_dimension_numbers<[1], [0], [0], [1], [0, 0, 1, 1], [], []>} : vector<2x64xbf16>, vector<64x64xbf16>, vector<2x64xf32> -> vector<2x64xf32>
    %112 = arith.addf %104, %111 : vector<2x64xf32>
    %c0_102 = arith.constant 0 : index
    %c0_103 = arith.constant 0 : index
    %113 = vector.load %arg10[%c0_102, %c0_103] : memref<1x64xf32, #tpu.memory_space<vmem>>, vector<1x64xf32>
    %114 = vector.broadcast %113 : vector<1x64xf32> to vector<2x64xf32>
    %115 = arith.addf %112, %114 : vector<2x64xf32>
    %cst_104 = arith.constant 0.000000e+00 : f32
    %116 = vector.broadcast %cst_104 : f32 to vector<2x64xf32>
    %117 = arith.cmpf oge, %115, %116 : vector<2x64xf32>
    %cst_105 = arith.constant 0.00999999977 : f32
    %118 = vector.broadcast %cst_105 : f32 to vector<2x64xf32>
    %119 = arith.mulf %118, %115 : vector<2x64xf32>
    %120 = arith.select %117, %115, %119 : vector<2x64xi1>, vector<2x64xf32>
    %121 = arith.truncf %120 : vector<2x64xf32> to vector<2x64xbf16>
    %c0_106 = arith.constant 0 : index
    %c0_107 = arith.constant 0 : index
    %c0_108 = arith.constant 0 : index
    %122 = vector.load %arg11[%c0_106, %c0_107, %c0_108] : memref<3x2x2xbf16, #tpu.memory_space<vmem>>, vector<1x2x2xbf16>
    %123 = vector.shape_cast %122 : vector<1x2x2xbf16> to vector<2x2xbf16>
    %cst_109 = arith.constant dense<0.000000e+00> : vector<2x64xf32>
    %124 = tpu.matmul %123, %121, %cst_109 {dimension_numbers = #tpu.dot_dimension_numbers<[1], [0], [0], [1], [0, 0, 1, 1], [], []>} : vector<2x2xbf16>, vector<2x64xbf16>, vector<2x64xf32> -> vector<2x64xf32>
    %125 = arith.truncf %124 : vector<2x64xf32> to vector<2x64xbf16>
    %c0_110 = arith.constant 0 : index
    %c0_111 = arith.constant 0 : index
    %c0_112 = arith.constant 0 : index
    %126 = vector.load %arg12[%c0_110, %c0_111, %c0_112] : memref<3x64x2xbf16, #tpu.memory_space<vmem>>, vector<1x64x2xbf16>
    %127 = vector.shape_cast %126 : vector<1x64x2xbf16> to vector<64x2xbf16>
    %cst_113 = arith.constant dense<0.000000e+00> : vector<2x2xf32>
    %128 = tpu.matmul %125, %127, %cst_113 {dimension_numbers = #tpu.dot_dimension_numbers<[1], [0], [0], [1], [0, 0, 1, 1], [], []>} : vector<2x64xbf16>, vector<64x2xbf16>, vector<2x2xf32> -> vector<2x2xf32>
    %c1_114 = arith.constant 1 : index
    %c0_115 = arith.constant 0 : index
    %c0_116 = arith.constant 0 : index
    %129 = vector.load %arg11[%c1_114, %c0_115, %c0_116] : memref<3x2x2xbf16, #tpu.memory_space<vmem>>, vector<1x2x2xbf16>
    %130 = vector.shape_cast %129 : vector<1x2x2xbf16> to vector<2x2xbf16>
    %cst_117 = arith.constant dense<0.000000e+00> : vector<2x64xf32>
    %131 = tpu.matmul %130, %121, %cst_117 {dimension_numbers = #tpu.dot_dimension_numbers<[1], [0], [0], [1], [0, 0, 1, 1], [], []>} : vector<2x2xbf16>, vector<2x64xbf16>, vector<2x64xf32> -> vector<2x64xf32>
    %132 = arith.truncf %131 : vector<2x64xf32> to vector<2x64xbf16>
    %c1_118 = arith.constant 1 : index
    %c0_119 = arith.constant 0 : index
    %c0_120 = arith.constant 0 : index
    %133 = vector.load %arg12[%c1_118, %c0_119, %c0_120] : memref<3x64x2xbf16, #tpu.memory_space<vmem>>, vector<1x64x2xbf16>
    %134 = vector.shape_cast %133 : vector<1x64x2xbf16> to vector<64x2xbf16>
    %cst_121 = arith.constant dense<0.000000e+00> : vector<2x2xf32>
    %135 = tpu.matmul %132, %134, %cst_121 {dimension_numbers = #tpu.dot_dimension_numbers<[1], [0], [0], [1], [0, 0, 1, 1], [], []>} : vector<2x64xbf16>, vector<64x2xbf16>, vector<2x2xf32> -> vector<2x2xf32>
    %136 = arith.addf %128, %135 : vector<2x2xf32>
    %c2_122 = arith.constant 2 : index
    %c0_123 = arith.constant 0 : index
    %c0_124 = arith.constant 0 : index
    %137 = vector.load %arg11[%c2_122, %c0_123, %c0_124] : memref<3x2x2xbf16, #tpu.memory_space<vmem>>, vector<1x2x2xbf16>
    %138 = vector.shape_cast %137 : vector<1x2x2xbf16> to vector<2x2xbf16>
    %cst_125 = arith.constant dense<0.000000e+00> : vector<2x64xf32>
    %139 = tpu.matmul %138, %121, %cst_125 {dimension_numbers = #tpu.dot_dimension_numbers<[1], [0], [0], [1], [0, 0, 1, 1], [], []>} : vector<2x2xbf16>, vector<2x64xbf16>, vector<2x64xf32> -> vector<2x64xf32>
    %140 = arith.truncf %139 : vector<2x64xf32> to vector<2x64xbf16>
    %c2_126 = arith.constant 2 : index
    %c0_127 = arith.constant 0 : index
    %c0_128 = arith.constant 0 : index
    %141 = vector.load %arg12[%c2_126, %c0_127, %c0_128] : memref<3x64x2xbf16, #tpu.memory_space<vmem>>, vector<1x64x2xbf16>
    %142 = vector.shape_cast %141 : vector<1x64x2xbf16> to vector<64x2xbf16>
    %cst_129 = arith.constant dense<0.000000e+00> : vector<2x2xf32>
    %143 = tpu.matmul %140, %142, %cst_129 {dimension_numbers = #tpu.dot_dimension_numbers<[1], [0], [0], [1], [0, 0, 1, 1], [], []>} : vector<2x64xbf16>, vector<64x2xbf16>, vector<2x2xf32> -> vector<2x2xf32>
    %144 = arith.addf %136, %143 : vector<2x2xf32>
    %c0_130 = arith.constant 0 : index
    %c0_131 = arith.constant 0 : index
    %c0_132 = arith.constant 0 : index
    %145 = vector.load %arg15[%c0_130, %c0_131, %c0_132] : memref<1x2x2xf32, #tpu.memory_space<vmem>>, vector<1x2x2xf32>
    %146 = vector.shape_cast %145 : vector<1x2x2xf32> to vector<2x2xf32>
    %147 = vector.shape_cast %144 : vector<2x2xf32> to vector<1x2x2xf32>
    tpu.vector_store %arg15[%c0_130, %c0_131, %c0_132], %147 {strides = array<i32>} : memref<1x2x2xf32, #tpu.memory_space<vmem>>, vector<1x2x2xf32>,
    %c0_133 = arith.constant 0 : index
    %c0_134 = arith.constant 0 : index
    %c0_135 = arith.constant 0 : index
    %148 = vector.load %arg13[%c0_133, %c0_134, %c0_135] : memref<2x1x2xbf16, #tpu.memory_space<vmem>>, vector<1x1x2xbf16>
    %149 = vector.shape_cast %148 : vector<1x1x2xbf16> to vector<1x2xbf16>
    %cst_136 = arith.constant dense<0.000000e+00> : vector<1x64xf32>
    %150 = tpu.matmul %149, %121, %cst_136 {dimension_numbers = #tpu.dot_dimension_numbers<[1], [0], [0], [1], [0, 0, 1, 1], [], []>} : vector<1x2xbf16>, vector<2x64xbf16>, vector<1x64xf32> -> vector<1x64xf32>
    %151 = arith.truncf %150 : vector<1x64xf32> to vector<1x64xbf16>
    %c0_137 = arith.constant 0 : index
    %c0_138 = arith.constant 0 : index
    %c0_139 = arith.constant 0 : index
    %152 = vector.load %arg14[%c0_137, %c0_138, %c0_139] : memref<2x64x5xbf16, #tpu.memory_space<vmem>>, vector<1x64x5xbf16>
    %153 = vector.shape_cast %152 : vector<1x64x5xbf16> to vector<64x5xbf16>
    %cst_140 = arith.constant dense<0.000000e+00> : vector<1x5xf32>
    %154 = tpu.matmul %151, %153, %cst_140 {dimension_numbers = #tpu.dot_dimension_numbers<[1], [0], [0], [1], [0, 0, 1, 1], [], []>} : vector<1x64xbf16>, vector<64x5xbf16>, vector<1x5xf32> -> vector<1x5xf32>
    %c1_141 = arith.constant 1 : index
    %c0_142 = arith.constant 0 : index
    %c0_143 = arith.constant 0 : index
    %155 = vector.load %arg13[%c1_141, %c0_142, %c0_143] : memref<2x1x2xbf16, #tpu.memory_space<vmem>>, vector<1x1x2xbf16>
    %156 = vector.shape_cast %155 : vector<1x1x2xbf16> to vector<1x2xbf16>
    %cst_144 = arith.constant dense<0.000000e+00> : vector<1x64xf32>
    %157 = tpu.matmul %156, %121, %cst_144 {dimension_numbers = #tpu.dot_dimension_numbers<[1], [0], [0], [1], [0, 0, 1, 1], [], []>} : vector<1x2xbf16>, vector<2x64xbf16>, vector<1x64xf32> -> vector<1x64xf32>
    %158 = arith.truncf %157 : vector<1x64xf32> to vector<1x64xbf16>
    %c1_145 = arith.constant 1 : index
    %c0_146 = arith.constant 0 : index
    %c0_147 = arith.constant 0 : index
    %159 = vector.load %arg14[%c1_145, %c0_146, %c0_147] : memref<2x64x5xbf16, #tpu.memory_space<vmem>>, vector<1x64x5xbf16>
    %160 = vector.shape_cast %159 : vector<1x64x5xbf16> to vector<64x5xbf16>
    %cst_148 = arith.constant dense<0.000000e+00> : vector<1x5xf32>
    %161 = tpu.matmul %158, %160, %cst_148 {dimension_numbers = #tpu.dot_dimension_numbers<[1], [0], [0], [1], [0, 0, 1, 1], [], []>} : vector<1x64xbf16>, vector<64x5xbf16>, vector<1x5xf32> -> vector<1x5xf32>
    %162 = arith.addf %154, %161 : vector<1x5xf32>
    %c0_149 = arith.constant 0 : index
    %c0_150 = arith.constant 0 : index
    %c0_151 = arith.constant 0 : index
    %163 = vector.load %arg16[%c0_149, %c0_150, %c0_151] : memref<1x1x5xf32, #tpu.memory_space<vmem>>, vector<1x1x5xf32>
    %164 = vector.shape_cast %163 : vector<1x1x5xf32> to vector<1x5xf32>
    %165 = vector.shape_cast %162 : vector<1x5xf32> to vector<1x1x5xf32>
    tpu.vector_store %arg16[%c0_149, %c0_150, %c0_151], %165 {strides = array<i32>} : memref<1x1x5xf32, #tpu.memory_space<vmem>>, vector<1x1x5xf32>,
    return
  }
  func.func @transform_0(%arg0: i32) -> (i32, i32, i32) {
    %c0_i32 = arith.constant 0 : i32
    %c0_i32_0 = arith.constant 0 : i32
    %c0_i32_1 = arith.constant 0 : i32
    return %arg0, %c0_i32, %c0_i32_0 : i32, i32, i32
  }
  func.func @transform_1(%arg0: i32) -> (i32, i32, i32) {
    %c0_i32 = arith.constant 0 : i32
    %c0_i32_0 = arith.constant 0 : i32
    %c0_i32_1 = arith.constant 0 : i32
    %c0_i32_2 = arith.constant 0 : i32
    return %c0_i32, %c0_i32_0, %c0_i32_1 : i32, i32, i32
  }
  func.func @transform_2(%arg0: i32) -> (i32, i32, i32) {
    %c0_i32 = arith.constant 0 : i32
    %c0_i32_0 = arith.constant 0 : i32
    %c0_i32_1 = arith.constant 0 : i32
    %c0_i32_2 = arith.constant 0 : i32
    return %c0_i32, %c0_i32_0, %c0_i32_1 : i32, i32, i32
  }
  func.func @transform_3(%arg0: i32) -> (i32, i32) {
    %c0_i32 = arith.constant 0 : i32
    %c0_i32_0 = arith.constant 0 : i32
    %c0_i32_1 = arith.constant 0 : i32
    return %c0_i32, %c0_i32_0 : i32, i32
  }
  func.func @transform_4(%arg0: i32) -> (i32, i32, i32) {
    %c0_i32 = arith.constant 0 : i32
    %c0_i32_0 = arith.constant 0 : i32
    %c0_i32_1 = arith.constant 0 : i32
    %c0_i32_2 = arith.constant 0 : i32
    return %c0_i32, %c0_i32_0, %c0_i32_1 : i32, i32, i32
  }
  func.func @transform_5(%arg0: i32) -> (i32, i32, i32) {
    %c0_i32 = arith.constant 0 : i32
    %c0_i32_0 = arith.constant 0 : i32
    %c0_i32_1 = arith.constant 0 : i32
    %c0_i32_2 = arith.constant 0 : i32
    return %c0_i32, %c0_i32_0, %c0_i32_1 : i32, i32, i32
  }
  func.func @transform_6(%arg0: i32) -> (i32, i32) {
    %c0_i32 = arith.constant 0 : i32
    %c0_i32_0 = arith.constant 0 : i32
    %c0_i32_1 = arith.constant 0 : i32
    return %c0_i32, %c0_i32_0 : i32, i32
  }
  func.func @transform_7(%arg0: i32) -> (i32, i32, i32) {
    %c0_i32 = arith.constant 0 : i32
    %c0_i32_0 = arith.constant 0 : i32
    %c0_i32_1 = arith.constant 0 : i32
    %c0_i32_2 = arith.constant 0 : i32
    return %c0_i32, %c0_i32_0, %c0_i32_1 : i32, i32, i32
  }
  func.func @transform_8(%arg0: i32) -> (i32, i32, i32) {
    %c0_i32 = arith.constant 0 : i32
    %c0_i32_0 = arith.constant 0 : i32
    %c0_i32_1 = arith.constant 0 : i32
    %c0_i32_2 = arith.constant 0 : i32
    return %c0_i32, %c0_i32_0, %c0_i32_1 : i32, i32, i32
  }
  func.func @transform_9(%arg0: i32) -> (i32, i32) {
    %c0_i32 = arith.constant 0 : i32
    %c0_i32_0 = arith.constant 0 : i32
    %c0_i32_1 = arith.constant 0 : i32
    return %c0_i32, %c0_i32_0 : i32, i32
  }
  func.func @transform_10(%arg0: i32) -> (i32, i32, i32) {
    %c0_i32 = arith.constant 0 : i32
    %c0_i32_0 = arith.constant 0 : i32
    %c0_i32_1 = arith.constant 0 : i32
    %c0_i32_2 = arith.constant 0 : i32
    return %c0_i32, %c0_i32_0, %c0_i32_1 : i32, i32, i32
  }
  func.func @transform_11(%arg0: i32) -> (i32, i32, i32) {
    %c0_i32 = arith.constant 0 : i32
    %c0_i32_0 = arith.constant 0 : i32
    %c0_i32_1 = arith.constant 0 : i32
    %c0_i32_2 = arith.constant 0 : i32
    return %c0_i32, %c0_i32_0, %c0_i32_1 : i32, i32, i32
  }
  func.func @transform_12(%arg0: i32) -> (i32, i32, i32) {
    %c0_i32 = arith.constant 0 : i32
    %c0_i32_0 = arith.constant 0 : i32
    %c0_i32_1 = arith.constant 0 : i32
    %c0_i32_2 = arith.constant 0 : i32
    return %c0_i32, %c0_i32_0, %c0_i32_1 : i32, i32, i32
  }
  func.func @transform_13(%arg0: i32) -> (i32, i32, i32) {
    %c0_i32 = arith.constant 0 : i32
    %c0_i32_0 = arith.constant 0 : i32
    %c0_i32_1 = arith.constant 0 : i32
    %c0_i32_2 = arith.constant 0 : i32
    return %c0_i32, %c0_i32_0, %c0_i32_1 : i32, i32, i32
  }
  func.func @transform_14(%arg0: i32) -> (i32, i32, i32) {
    %c0_i32 = arith.constant 0 : i32
    %c0_i32_0 = arith.constant 0 : i32
    %c0_i32_1 = arith.constant 0 : i32
    return %arg0, %c0_i32, %c0_i32_0 : i32, i32, i32
  }
  func.func @transform_15(%arg0: i32) -> (i32, i32, i32) {
    %c0_i32 = arith.constant 0 : i32
    %c0_i32_0 = arith.constant 0 : i32
    %c0_i32_1 = arith.constant 0 : i32
    return %arg0, %c0_i32, %c0_i32_0 : i32, i32, i32
  }
}

</mosaic_0001>

<bundles_post_ra>
// kernel: discriminator_forward.1
= control target key start
LH: loop header
LB: loop body
LE: loop exit
PB: predicated region body
PF: predicated region fallthrough
CT: control target
= control target key end

     0   :  { %s4842_s0 = inlined_call_operand.vmem [shape: bf16[2,16,48], index: 0, kind: input, shape index: {}]   ;;  %s4843_s1 = inlined_call_operand.hbm [shape: bf16[4,8,16], index: 1, kind: input, shape index: {}]   ;;  %s4844_s2 = inlined_call_operand.hbm [shape: bf16[4,48,64], index: 2, kind: input, shape index: {}]   ;;  %s4845_s3 = inlined_call_operand.hbm [shape: f32[1,64], index: 3, kind: input, shape index: {}]   ;;  %s4846_s4 = inlined_call_operand.hbm [shape: bf16[4,4,8], index: 4, kind: input, shape index: {}]   ;;  %s4847_s5 = inlined_call_operand.vmem [shape: bf16[4,64,64], index: 5, kind: input, shape index: {}]   ;;  %s4848_s6 = inlined_call_operand.hbm [shape: f32[1,64], index: 6, kind: input, shape index: {}]   ;;  %s4849_s7 = inlined_call_operand.hbm [shape: bf16[4,2,4], index: 7, kind: input, shape index: {}]   ;;  %s4850_s8 = inlined_call_operand.vmem [shape: bf16[4,64,64], index: 8, kind: input, shape index: {}]   ;;  %s4851_s9 = inlined_call_operand.vmem [shape: f32[1,64], index: 9, kind: input, shape index: {}]   ;;  %s4852_s10 = inlined_call_operand.hbm [shape: bf16[3,2,2], index: 10, kind: input, shape index: {}]   ;;  %s4853_s11 = inlined_call_operand.vmem [shape: bf16[3,64,2], index: 11, kind: input, shape index: {}]   ;;  %s4854_s12 = inlined_call_operand.vmem [shape: bf16[2,1,2], index: 12, kind: input, shape index: {}]   ;;  %s4855_s13 = inlined_call_operand.hbm [shape: bf16[2,64,5], index: 13, kind: input, shape index: {}]   ;;  %s4856_s14 = inlined_call_operand.hbm [shape: f32[2,2,2], index: 14, kind: output, shape index: {0}]   ;;  %s4857_s15 = inlined_call_operand.hbm [shape: f32[2,1,5], index: 15, kind: output, shape index: {1}]  }
   0x1   :  { %4878 = sst [smem:[#allocation34_spill]] %s4844_s2 }
   0x2   :  { %4879 = sst [smem:[#allocation35_spill]] %s4846_s4 }
   0x3   :  { %4880 = sst [smem:[#allocation36_spill]] %s4854_s12 }
   0x4   :  { %4881 = sst [smem:[#allocation37_spill]] %s4856_s14 }
   0x5   :  { %4882 = sst [smem:[#allocation38_spill]] %s4857_s15 }
   0x6   :  { %21 = vsyncpa [#allocation3], 0 }
   0x7   :  { %22 = vsyncpa [#allocation6], 0 }
   0x8   :  { %23 = vsyncpa [#allocation9], 0 }
   0x9   :  { %24 = vsyncpa [#allocation12], 0 }
   0xa   :  { %25 = vsyncpa [#allocation15], 0 }
   0xb   :  { %26 = vsyncpa [#allocation4], 0 }
   0xc   :  { %28 = vsyncpa [#allocation4 + $0x1], 0 }
   0xd   :  { %29 = vsyncpa [#allocation18], 0 }
   0xe   :  { %31 = vsyncpa [#allocation18 + $0x1], 0  ;;  %s4176_s18 = smov 0   ;;  %s4178_s19 = smov 0  }
   0xf   :  { %s4180_s20 = smov 0   ;;  %s4182_s21 = smov 0  }
  0x10 LB: > { %4883 = sst [smem:[#allocation26_spill]] %s4064_s18  ;;  %s4197_s22 = sadd.s32 4294967295, %s4076_s21   ;;  %s4076_s21 = sphi %s4182_s21, %s4922_s21   ;;  %s4072_s20 = sphi %s4180_s20, %s4925_s20   ;;  %s4068_s19 = sphi %s4178_s19, %s4924_s19   ;;  %s4064_s18 = sphi %s4176_s18, %s4923_s18  }
  0x11   : > { %4884 = sst [smem:[#allocation27_spill]] %s4068_s19  ;;  %s2919_s23 = sadd.s32 4294967294, %s4076_s21  }
  0x12   : > { %4885 = sst [smem:[#allocation28_spill]] %s4072_s20  ;;  %s4201_s24 = sadd.s32 1, %s4076_s21  }
  0x13   : > { %4886 = sst [smem:[#allocation29_spill]] %s4076_s21  ;;  %s343_s25 = sadd.s32 1, %s4072_s20 }
  0x14   : > { %4887 = sst [smem:[#allocation30_spill]] %s4201_s24  ;;  %s340_s26 = ssub.s32 %s4076_s21, %s4201_s24 }
  0x15   : > { %p353_p0 = scmp.ne.s32.totalorder %s4072_s20, %s4068_s19  ;;  %p341_p1 = scmp.eq.s32.totalorder %s340_s26, 0 }
  0x16   : > { %p354_p2 = scmp.eq.s32.totalorder %s4197_s22, 1  ;;  %p359_p3 = scmp.ne.s32.totalorder %s4068_s19, %s4064_s18 }
  0x17   : > { %p360_p4 = scmp.eq.s32.totalorder %s2919_s23, 1  ;;  %p2920_p7 = scmp.ge.s32.totalorder %s4076_s21, 1 }
  0x18   : > { %s4212_s27 = scalar_select %p341_p1, %s4072_s20, %s343_s25  }
  0x19   : > { %p4214_p5 = por %p354_p2, %p353_p0  ;;  %p4218_p6 = por %p360_p4, %p359_p3 }
  0x1a   : > { %4888 = sst [smem:[#allocation31_spill]] %s4212_s27  ;;  %p393_p8 = scmp.lt.s32.totalorder %s4076_s21, 3 }
  0x1b   : > { %s4889_s28 = scalar_select %p4214_p5, 1, 0 }
  0x1c   : > { %s4891_s29 = scalar_select %p4218_p6, 1, 0 }
  0x1d   : > { %4890 = sst [smem:[#allocation32_spill]] %s4889_s28  ;;  %p4864_p9 = scmp.eq.s32.totalorder %s4197_s22, 0 }
  0x1e   : > { %4892 = sst [smem:[#allocation33_spill]] %s4891_s29  ;;  %p4225_p10 = pnand %p2920_p7, %p393_p8 }
  0x1f   : > { %s4078_s16 = smov [#allocation5]   ;;  %s4079_s25 = smov [#allocation8]  }
  0x20   : > { %s4893_s30 = scalar_select %p4225_p10, 1, 0 }
  0x21   : > { %p3576_p11 = pneg %p4225_p10  ;;  %s418_s17 = sshll.u32 %s4078_s16, 4  ;;  %s419_s17 = int_to_ptr.vmem [resolvable:$true] %s418_s17 }
  0x22   : > { %s442_s26 = sshll.u32 %s4079_s25, 4  ;;  %s4895_s2 = sld [smem:[#allocation34_spill]]  ;;  %s4237_s26 = int_to_ptr.vmem [resolvable:$true] %s442_s26 }
  0x23   : > { %p4233_p12 = pnand %p4864_p9, %p3576_p11 }
  0x25   : > { %p4247_p0 = pneg %p4233_p12 }
  0x28   : > { %s3738_s24 = scalar_lea.hbm %s4895_s2, 1536 }
  0x29   : > { %p3739_p13 = scmp.ne.s32.totalorder %s4895_s2, %s3738_s24  ;;  %p3745_p3 = scmp.lt.u32.totalorder %s3738_s24, %s4895_s2 }
  0x2b   : > { %p3741_p1 = pnand %p4247_p0, %p3739_p13 }
  0x2d   : > { %p3742_p2 = pneg %p3741_p1 }
  0x2f   : > { %p3747_p4 = pnand %p3745_p3, %p3742_p2 }
  0x31   : > { %3750 = shalt.err (!%p3747_p4)
}
  0x32   : > { %s3751_s20 = scalar_lea.vmem %s419_s17, 1536  ;;  %p3759_p9 = scmp.lt.s32.totalorder %s419_s17, %s419_s17 }
  0x33   : > { %p3752_p7 = scmp.ne.s32.totalorder %s419_s17, %s3751_s20  ;;  %p3760_p6 = scmp.lt.s32.totalorder %s3751_s20, %s3751_s20 }
  0x35   : > { %p3754_p8 = pnand %p3752_p7, %p4247_p0  ;;  %p3761_p5 = por %p3760_p6, %p3759_p9 }
  0x37   : > { %p3755_p11 = pneg %p3754_p8 }
  0x39   : > { %p3762_p10 = pnand %p3761_p5, %p3755_p11 }
  0x3b   : > { %3765 = shalt.err (!%p3762_p10)
}
  0x3c   : > { %s4872_s18 = smov 64   ;;  %s4874_s27 = smov 4  }
  0x3d   : > { %3582 = dma.hbm_to_vmem [thread:$0]  (!%p4233_p12), %s4895_s2, 1536, %s419_s17, [#allocation6], %s4872_s18, %s4872_s18, %s4874_s27  }
  0x3e   : > { %s4897_s4 = sld [smem:[#allocation35_spill]] }
  0x44   : > { %s3766_s15 = scalar_lea.hbm %s4897_s4, 128 }
  0x45   : > { %p3767_p5 = scmp.ne.s32.totalorder %s4897_s4, %s3766_s15  ;;  %p3773_p10 = scmp.lt.u32.totalorder %s3766_s15, %s4897_s4 }
  0x47   : > { %p3769_p6 = pnand %p3767_p5, %p4247_p0 }
  0x49   : > { %p3770_p9 = pneg %p3769_p6 }
  0x4b   : > { %p3775_p13 = pnand %p3773_p10, %p3770_p9 }
  0x4d   : > { %3778 = shalt.err (!%p3775_p13)
}
  0x4e   : > { %s3779_s17 = scalar_lea.vmem %s4237_s26, 128  ;;  %p3787_p4 = scmp.lt.s32.totalorder %s4237_s26, %s4237_s26 }
  0x4f   : > { %p3780_p1 = scmp.ne.s32.totalorder %s4237_s26, %s3779_s17  ;;  %p3788_p7 = scmp.lt.s32.totalorder %s3779_s17, %s3779_s17 }
  0x51   : > { %p3782_p2 = pnand %p3780_p1, %p4247_p0  ;;  %p3789_p8 = por %p3788_p7, %p3787_p4 }
  0x53   : > { %p3783_p3 = pneg %p3782_p2 }
  0x55   : > { %p3790_p11 = pnand %p3789_p8, %p3783_p3 }
  0x57   : > { %3793 = shalt.err (!%p3790_p11)
}
  0x58   : > { %s4082_s14 = smov 32   ;;  %s4083_s15 = smov 2  }
  0x59   : > { %3588 = dma.hbm_to_vmem [thread:$0]  (!%p4233_p12), %s4897_s4, 128, %s4237_s26, [#allocation9], %s4082_s14, %s4082_s14, %s4083_s15  }
  0x5a   : > { %s4084_s21 = smov [#allocation11]   ;;  %s3794_s20 = scalar_lea.hbm %s4849_s7, 64 }
  0x5b   : > { %s469_s24 = sshll.u32 %s4084_s21, 4  ;;  %p3795_p5 = scmp.ne.s32.totalorder %s4849_s7, %s3794_s20  ;;  %s470_s24 = int_to_ptr.vmem [resolvable:$true] %s469_s24 }
  0x5c   : > { %p3801_p10 = scmp.lt.u32.totalorder %s3794_s20, %s4849_s7 }
  0x5d   : > { %p3797_p6 = pnand %p3795_p5, %p4247_p0 }
  0x5f   : > { %p3798_p9 = pneg %p3797_p6 }
  0x61   : > { %p3803_p13 = pnand %p3801_p10, %p3798_p9 }
  0x63   : > { %3806 = shalt.err (!%p3803_p13)
}
  0x64   : > { %s3807_s26 = scalar_lea.vmem %s470_s24, 64  ;;  %p3815_p4 = scmp.lt.s32.totalorder %s470_s24, %s470_s24 }
  0x65   : > { %p3808_p1 = scmp.ne.s32.totalorder %s470_s24, %s3807_s26  ;;  %p3816_p7 = scmp.lt.s32.totalorder %s3807_s26, %s3807_s26 }
  0x67   : > { %p3810_p2 = pnand %p3808_p1, %p4247_p0  ;;  %p3817_p8 = por %p3816_p7, %p3815_p4 }
  0x69   : > { %p3811_p3 = pneg %p3810_p2 }
  0x6b   : > { %p3818_p11 = pnand %p3817_p8, %p3811_p3 }
  0x6d   : > { %3821 = shalt.err (!%p3818_p11)
}
  0x6e   : > { %s4877_s18 = smov 16   ;;  %s4086_s14 = smov 1  }
  0x6f   : > { %3594 = dma.hbm_to_vmem [thread:$0]  (!%p4233_p12), %s4849_s7, 64, %s470_s24, [#allocation12], %s4877_s18, %s4877_s18, %s4086_s14  }
  0x70   : > { %s4087_s15 = smov [#allocation2]   ;;  %s4088_s28 = smov [#allocation7]  }
  0x71   : > { %s405_s19 = sshll.u32 %s4087_s15, 4  ;;  %s432_s21 = sshll.u32 %s4088_s28, 4  ;;  %s406_s19 = int_to_ptr.vmem [resolvable:$true] %s405_s19  ;;  %s433_s21 = int_to_ptr.vmem [resolvable:$true] %s432_s21 }
  0x72   : > { %s3822_s20 = scalar_lea.hbm %s4843_s1, 256 }
  0x73   : > { %p3823_p5 = scmp.ne.s32.totalorder %s4843_s1, %s3822_s20  ;;  %p3829_p10 = scmp.lt.u32.totalorder %s3822_s20, %s4843_s1 }
  0x75   : > { %p3825_p6 = pnand %p3823_p5, %p4247_p0 }
  0x77   : > { %p3826_p9 = pneg %p3825_p6 }
  0x79   : > { %p3831_p13 = pnand %p3829_p10, %p3826_p9 }
  0x7b   : > { %3834 = shalt.err (!%p3831_p13)
}
  0x7c   : > { %s3835_s24 = scalar_lea.vmem %s406_s19, 256  ;;  %p3843_p4 = scmp.lt.s32.totalorder %s406_s19, %s406_s19 }
  0x7d   : > { %p3836_p1 = scmp.ne.s32.totalorder %s406_s19, %s3835_s24  ;;  %p3844_p7 = scmp.lt.s32.totalorder %s3835_s24, %s3835_s24 }
  0x7f   : > { %p3838_p2 = pnand %p3836_p1, %p4247_p0  ;;  %p3845_p8 = por %p3844_p7, %p3843_p4 }
  0x81   : > { %p3839_p3 = pneg %p3838_p2 }
  0x83   : > { %p3846_p11 = pnand %p3845_p8, %p3839_p3 }
  0x85   : > { %3849 = shalt.err (!%p3846_p11)
}
  0x86   : > { %s4898_s2 = smov 4   ;;  %s4899_s27 = smov 64  }
  0x87   : > { %3579 = dma.hbm_to_vmem [thread:$0]  (!%p4233_p12), %s4843_s1, 256, %s406_s19, [#allocation3], %s4899_s27, %s4899_s27, %s4898_s2  }
  0x88   : > { %s3850_s29 = scalar_lea.hbm %s4845_s3, 16 }
  0x89   : > { %p3851_p5 = scmp.ne.s32.totalorder %s4845_s3, %s3850_s29  ;;  %p3857_p10 = scmp.lt.u32.totalorder %s3850_s29, %s4845_s3 }
  0x8b   : > { %p3853_p6 = pnand %p3851_p5, %p4247_p0 }
  0x8d   : > { %p3854_p9 = pneg %p3853_p6 }
  0x8f   : > { %p3859_p13 = pnand %p3857_p10, %p3854_p9 }
  0x91   : > { %3862 = shalt.err (!%p3859_p13)
}
  0x92   : > { %s3863_s24 = scalar_lea.vmem %s433_s21, 16  ;;  %s3870_s19 = scalar_lea.vmem %s433_s21, 32 }
  0x93   : > { %p3864_p1 = scmp.ne.s32.totalorder %s433_s21, %s3863_s24  ;;  %p3871_p4 = scmp.lt.s32.totalorder %s433_s21, %s433_s21 }
  0x94   : > { %p3872_p7 = scmp.lt.s32.totalorder %s3870_s19, %s3863_s24 }
  0x95   : > { %p3866_p2 = pnand %p3864_p1, %p4247_p0 }
  0x96   : > { %p3873_p8 = por %p3872_p7, %p3871_p4 }
  0x97   : > { %p3867_p3 = pneg %p3866_p2 }
  0x99   : > { %p3874_p11 = pnand %p3873_p8, %p3867_p3 }
  0x9b   : > { %3877 = shalt.err (!%p3874_p11)
}
  0x9c   : > { %3585 = dma.hbm_to_vmem [thread:$0]  (!%p4233_p12), %s4845_s3, 16, %s433_s21, [#allocation6]  }
  0x9d   : > { %s4089_s15 = smov [#allocation10]   ;;  %s4090_s29 = smov [#allocation13]  }
  0x9e   : > { %s459_s28 = sshll.u32 %s4089_s15, 4  ;;  %s488_s25 = sshll.u32 %s4090_s29, 4  ;;  %s460_s28 = int_to_ptr.vmem [resolvable:$true] %s459_s28  ;;  %s489_s25 = int_to_ptr.vmem [resolvable:$true] %s488_s25 }
  0x9f   : > { %s3878_s26 = scalar_lea.hbm %s4848_s6, 16 }
  0xa0   : > { %p3879_p5 = scmp.ne.s32.totalorder %s4848_s6, %s3878_s26  ;;  %p3885_p10 = scmp.lt.u32.totalorder %s3878_s26, %s4848_s6 }
  0xa2   : > { %p3881_p6 = pnand %p3879_p5, %p4247_p0 }
  0xa4   : > { %p3882_p9 = pneg %p3881_p6 }
  0xa6   : > { %p3887_p13 = pnand %p3885_p10, %p3882_p9 }
  0xa8   : > { %3890 = shalt.err (!%p3887_p13)
}
  0xa9   : > { %s3891_s21 = scalar_lea.vmem %s460_s28, 16  ;;  %s3898_s12 = scalar_lea.vmem %s460_s28, 32 }
  0xaa   : > { %p3892_p1 = scmp.ne.s32.totalorder %s460_s28, %s3891_s21  ;;  %p3899_p4 = scmp.lt.s32.totalorder %s460_s28, %s460_s28 }
  0xab   : > { %p3900_p7 = scmp.lt.s32.totalorder %s3898_s12, %s3891_s21 }
  0xac   : > { %p3894_p2 = pnand %p3892_p1, %p4247_p0 }
  0xad   : > { %p3901_p8 = por %p3900_p7, %p3899_p4 }
  0xae   : > { %p3895_p3 = pneg %p3894_p2 }
  0xb0   : > { %p3902_p11 = pnand %p3901_p8, %p3895_p3 }
  0xb2   : > { %3905 = shalt.err (!%p3902_p11)
}
  0xb3   : > { %3591 = dma.hbm_to_vmem [thread:$0]  (!%p4233_p12), %s4848_s6, 16, %s460_s28, [#allocation9]  }
  0xb4   : > { %s3906_s17 = scalar_lea.hbm %s4852_s10, 48 }
  0xb5   : > { %p3907_p5 = scmp.ne.s32.totalorder %s4852_s10, %s3906_s17  ;;  %p3913_p10 = scmp.lt.u32.totalorder %s3906_s17, %s4852_s10 }
  0xb7   : > { %p3909_p6 = pnand %p3907_p5, %p4247_p0 }
  0xb9   : > { %p3910_p9 = pneg %p3909_p6 }
  0xbb   : > { %p3915_p13 = pnand %p3913_p10, %p3910_p9 }
  0xbd   : > { %3918 = shalt.err (!%p3915_p13)
}
  0xbe   : > { %s3919_s21 = scalar_lea.vmem %s489_s25, 48  ;;  %s3926_s28 = scalar_lea.vmem %s489_s25, 64 }
  0xbf   : > { %p3920_p1 = scmp.ne.s32.totalorder %s489_s25, %s3919_s21  ;;  %p3927_p4 = scmp.lt.s32.totalorder %s489_s25, %s489_s25 }
  0xc0   : > { %p3928_p7 = scmp.lt.s32.totalorder %s3926_s28, %s3919_s21 }
  0xc1   : > { %p3922_p2 = pnand %p3920_p1, %p4247_p0 }
  0xc2   : > { %p3929_p8 = por %p3928_p7, %p3927_p4 }
  0xc3   : > { %p3923_p3 = pneg %p3922_p2 }
  0xc5   : > { %p3930_p11 = pnand %p3929_p8, %p3923_p3 }
  0xc7   : > { %3933 = shalt.err (!%p3930_p11)
}
  0xc8   : > { %s4900_s12 = smov 16   ;;  %s4091_s18 = smov [#allocation14]  }
  0xc9   : > { %3597 = dma.hbm_to_vmem [thread:$0]  (!%p4233_p12), %s4852_s10, 48, %s489_s25, [#allocation12], %s4900_s12, %s4900_s12, %s4086_s14  }
  0xca   : > { %s507_s20 = sshll.u32 %s4091_s18, 4  ;;  %s3934_s24 = scalar_lea.hbm %s4855_s13, 1024  ;;  %s508_s20 = int_to_ptr.vmem [resolvable:$true] %s507_s20 }
  0xcb   : > { %p3935_p5 = scmp.ne.s32.totalorder %s4855_s13, %s3934_s24  ;;  %p3941_p10 = scmp.lt.u32.totalorder %s3934_s24, %s4855_s13 }
  0xcd   : > { %p3937_p6 = pnand %p3935_p5, %p4247_p0 }
  0xcf   : > { %p3938_p9 = pneg %p3937_p6 }
  0xd1   : > { %p3943_p13 = pnand %p3941_p10, %p3938_p9 }
  0xd3   : > { %3946 = shalt.err (!%p3943_p13)
}
  0xd4   : > { %s3947_s14 = scalar_lea.vmem %s508_s20, 1024  ;;  %p3955_p4 = scmp.lt.s32.totalorder %s508_s20, %s508_s20 }
  0xd5   : > { %p3948_p1 = scmp.ne.s32.totalorder %s508_s20, %s3947_s14  ;;  %p3956_p7 = scmp.lt.s32.totalorder %s3947_s14, %s3947_s14 }
  0xd7   : > { %p3950_p2 = pnand %p3948_p1, %p4247_p0  ;;  %p3957_p8 = por %p3956_p7, %p3955_p4 }
  0xd9   : > { %p3951_p3 = pneg %p3950_p2 }
  0xdb   : > { %p3958_p11 = pnand %p3957_p8, %p3951_p3 }
  0xdd   : > { %3961 = shalt.err (!%p3958_p11)
}
  0xde   : > { %3600 = dma.hbm_to_vmem [thread:$0]  (!%p4233_p12), %s4855_s13, 1024, %s508_s20, [#allocation15], %s4899_s27, %s4899_s27, %s4898_s2  }
  0xdf   : > { %p4901_p5 = scmp.ne.s32.totalorder %s4893_s30, 0 }
  0xe0   : > { %p4902_p0 = scmp.eq.s32.totalorder (!%p4901_p5), %s4197_s22, 0 }
  0xe1   : > { %531 = sbr.rel (%p4901_p5) target bundleno = 2788 (0xae4), region = 76 }
  0xe8   : > { %4035 = dma.done.wait (%p4902_p0), [#allocation3], 256   ;;  %p4903_p6 = pmov %p4902_p0 }
  0xe9   : > { %p4904_p9 = pmov %p4902_p0 }
  0xea   : > { %4037 = vsyncadd (%p4903_p6), [#allocation3], 4294967040 }
  0xeb   : > { %4039 = dma.done.wait (%p4904_p9), [#allocation6], 1552   ;;  %p4905_p10 = pmov %p4902_p0 }
  0xec   : > { %p4906_p13 = pmov %p4902_p0 }
  0xed   : > { %4041 = vsyncadd (%p4905_p10), [#allocation6], 4294965744 }
  0xee   : > { %4043 = dma.done.wait (%p4906_p13), [#allocation9], 144   ;;  %p4907_p12 = pmov %p4902_p0 }
  0xef   : > { %p4908_p1 = pmov %p4902_p0 }
  0xf0   : > { %4045 = vsyncadd (%p4907_p12), [#allocation9], 4294967152 }
  0xf1   : > { %4047 = dma.done.wait (%p4908_p1), [#allocation12], 112   ;;  %p4909_p2 = pmov %p4902_p0 }
  0xf2   : > { %p4910_p3 = pmov %p4902_p0 }
  0xf3   : > { %4049 = vsyncadd (%p4909_p2), [#allocation12], 4294967184 }
  0xf4   : > { %4051 = dma.done.wait (%p4910_p3), [#allocation15], 1024   ;;  %p4911_p4 = pmov %p4902_p0 }
  0xf5   : > { %p611_p7 = scmp.lt.s32.totalorder %s4197_s22, 1  ;;  %v4092_v0 = vmov 0.0   ;;  %vm4093_vm0 = vmmov 0   ;;  %v619_v2 = vld [vmem:[#allocation2] sm:$0xf]  ;;  %vm626_vm1 = vcmask 130048  }
  0xf6   : > { %4053 = vsyncadd (%p4911_p4), [#allocation15], 4294966272  ;;  %3230 = vmatprep.subr.bf16.mxu0 %v4092_v0  ;;  %3236 = vmatprep.subr.bf16.mxu1 %v4092_v0  ;;  %v678_v3 = vld [vmem:[#allocation2 + $0x4] sm:$0xf]  ;;  %v3674_v4 = vld [vmem:[#allocation5 + $0x18] sm:$0xff]   ;;  %vm748_vm2 = vcmask 392192  }
  0xf7   : > { %s612_s30 = scalar_select %p611_p7, %s4197_s22, 1  ;;  %3232 = vmatprep.mubr.msk.bf16.mxu0 %vm4093_vm0, %v4092_v0  ;;  %3238 = vmatprep.mubr.msk.bf16.mxu1 %vm4093_vm0, %v4092_v0  ;;  %v3675_v5 = vld [vmem:[#allocation5] sm:$0xff]   ;;  %v3677_v7 = vld [vmem:[#allocation5 + $0x8] sm:$0xff]   ;;  %v3679_v9 = vld [vmem:[#allocation5 + $0x10] sm:$0xff]   ;;  %vm1100_vm4 = vcmask 1043456   ;;  %vm1096_vm5 = vcmask 64512  }
  0xf8   : > { %v3676_v6 = vld [vmem:[#allocation5 + $0x20] sm:$0xff]   ;;  %v3678_v8 = vld [vmem:[#allocation5 + $0x28] sm:$0xff]   ;;  %v854_v20 = vld [vmem:[#allocation2 + $0x8] sm:$0xf]  ;;  %vm1232_vm6 = vcmask 523264   ;;  %vm1606_vm8 = vcmask 1041408  }
  0xf9   : > { %s3114_s23 = sshll.u32 %s612_s30, 3  ;;  %v969_v21 = vld [vmem:[#allocation2 + $0xc] sm:$0xf]  ;;  %v3680_v22 = vld [vmem:[#allocation5 + $0x30] sm:$0xff]   ;;  %v3682_v24 = vld [vmem:[#allocation5 + $0x40] sm:$0xff]   ;;  %vm1602_vm9 = vcmask 31744  }
  0xfa   : > { %s615_s27 = scalar_lea.vmem %s4842_s0, %s3114_s23  ;;  %v3681_v23 = vld [vmem:[#allocation5 + $0x38] sm:$0xff]   ;;  %v3683_v35 = vld [vmem:[#allocation5 + $0x48] sm:$0xff]   ;;  %v3684_v44 = vld [vmem:[#allocation5 + $0x50] sm:$0xff]   ;;  %vm2111_vm11 = vcmask 1040384   ;;  %vm2107_vm12 = vcmask 15360   ;;  %s4912_s23 = sld [smem:[#allocation36_spill]] }
  0xfb   : > { %v3673_v1 = vld [vmem:[%s615_s27] sm:$0xff]   ;;  %v3685_v45 = vld [vmem:[#allocation5 + $0x58] sm:$0xff]   ;;  %v2963_v55 = vld [vmem:[#allocation7] ss:$0 sm:$0xff]  ;;  %s4913_s29 = sld [smem:[#allocation27_spill]]  ;;  %s4914_s18 = sld [smem:[#allocation32_spill]] }
  0xfc   : > { %3231 = vmatpush3.bf16.msra.mxu0 %v3673_v1  ;;  %3237 = vmatpush3.bf16.msra.mxu1 %v3673_v1  ;;  %v3688_v47 = vld [vmem:[%s4847_s5 + $0x20] sm:$0xff]   ;;  %v3690_v48 = vld [vmem:[%s4847_s5 + $0x28] sm:$0xff]   ;;  %s3110_s26 = sshll.u32 %s4197_s22, 5  ;;  %vm2476_vm13 = vcmask 9216   ;;  %s4915_s28 = sld [smem:[#allocation37_spill]] }
  0xfd   : > { %3242 = vmatprep.subr.bf16.mxu0 %v4092_v0  ;;  %3252 = vmatprep.subr.bf16.mxu1 %v4092_v0  ;;  %s4094_s30 = smov [#allocation16]  }
  0xfe   : > { %s3966_s16 = sshll.u32 %s4094_s30, 4  ;;  %s3967_s16 = int_to_ptr.vmem [resolvable:$false] %s3966_s16 }
  0xff   : > { %3233 = vmatmul.mubr.msk.bf16.vlgmr.msra.gmra.mrb[0].mxu0 %vm626_vm1, %v619_v2  ;;  %3239 = vmatmul.mubr.msk.bf16.vlgmr.msra.gmra.mrb[0].mxu1 %vm626_vm1, %v678_v3  ;;  %v1095_v2 = vld [vmem:[#allocation8] sm:$0x3]  ;;  %v1154_v3 = vld [vmem:[#allocation8 + $0x2] sm:$0x3]  ;;  %s3968_s2 = scalar_lea.vmem %s3967_s16, 64 }
 0x100   : > { %3243 = vmatpush3.bf16.msra.mxu0 %v3674_v4  ;;  %3253 = vmatpush3.bf16.msra.mxu1 %v3675_v5  ;;  %v3686_v4 = vld [vmem:[%s4847_s5] sm:$0xff]   ;;  %v3687_v5 = vld [vmem:[%s4847_s5 + $0x8] sm:$0xff]  }
 0x101   : > { %3244 = vmatprep.subr.bf16.mxu0 %v4092_v0  ;;  %3254 = vmatprep.subr.bf16.mxu1 %v4092_v0  ;;  %s4761_s20 = sand.u32 1, %s4913_s29   ;;  %p4916_p11 = scmp.ne.s32.totalorder %s4914_s18, 0 }
 0x102   : > { %3248 = vmatprep.mubr.msk.bf16.mxu0 %vm4093_vm0, %v4092_v0  ;;  %3258 = vmatprep.mubr.msk.bf16.mxu1 %vm4093_vm0, %v4092_v0  ;;  %s2939_s17 = sshll.u32 %s4761_s20, 1  ;;  %s4768_s14 = scalar_lea.hbm %s4915_s28, %s3110_s26 }
 0x103   : > { %s604_s24 = scalar_lea.vmem [#allocation16], %s2939_s17  ;;  %s2723_s25 = scalar_lea.sflag [#allocation4], %s4761_s20 }
 0x104   : > { %3245 = vmatpush3.bf16.msra.mxu0 %v3676_v6  ;;  %3255 = vmatpush3.bf16.msra.mxu1 %v3677_v7  ;;  %v3689_v6 = vld [vmem:[%s4847_s5 + $0x10] sm:$0xff]   ;;  %v3691_v7 = vld [vmem:[%s4847_s5 + $0x18] sm:$0xff]   ;;  %s2740_s19 = sshll.u32 %s604_s24, 4  ;;  %s4770_s19 = int_to_ptr.vmem [resolvable:$true] %s2740_s19 }
 0x105   : > { %3246 = vmatprep.subr.bf16.mxu0 %v4092_v0  ;;  %3256 = vmatprep.subr.bf16.mxu1 %v4092_v0  ;;  %s3962_s12 = scalar_lea.vmem %s4770_s19, 32  ;;  %p3969_p6 = scmp.lt.s32.totalorder %s4770_s19, %s3967_s16 }
 0x106   : > { %p3963_p8 = scmp.ne.s32.totalorder %s4770_s19, %s3962_s12  ;;  %p3970_p9 = scmp.lt.s32.totalorder %s3968_s2, %s3962_s12 }
 0x108   : > { %3247 = vmatpush3.bf16.msra.mxu0 %v3678_v8  ;;  %3257 = vmatpush3.bf16.msra.mxu1 %v3679_v9  ;;  %v3692_v8 = vld [vmem:[%s4847_s5 + $0x30] sm:$0xff]   ;;  %v3693_v9 = vld [vmem:[%s4847_s5 + $0x38] sm:$0xff]   ;;  %p3964_p5 = pnand %p3963_p8, %p4916_p11  ;;  %p3971_p10 = por %p3970_p9, %p3969_p6 }
 0x109   : > { %3262 = vmatprep.subr.bf16.mxu1 %v4092_v0  ;;  %3278 = vmatprep.subr.bf16.mxu0 %v4092_v0 }
 0x10a   : > { %p3965_p0 = pneg %p3964_p5 }
 0x10c   : > { %p3972_p13 = pnand %p3971_p10, %p3965_p0 }
 0x1d2   : > { %v664_v10 = vpop.f32.mrb[0].mxu0  ;;  %v716_v11 = vpop.f32.mrb[0].mxu1 }
 0x1d3   : > { %v670_v12 = vpack.c.bf16 %v664_v10, %v664_v10  ;;  %v722_v13 = vpack.c.bf16 %v716_v11, %v716_v11  ;;  %v3234_v14 = vpop.f32.mrb[1].mxu0  ;;  %v3240_v15 = vpop.f32.mrb[1].mxu1 }
 0x1d4   : > { %v667_v16 = vpop.f32.mrb[2].mxu0  ;;  %v719_v17 = vpop.f32.mrb[2].mxu1 }
 0x1d5   : > { %v3235_v18 = vpop.f32.mrb[3].mxu0  ;;  %3249 = vmatmul.mubr.msk.bf16.vlgmr.msra.gmra.mrb[4].mxu0 %vm748_vm2, %v722_v13  ;;  %3259 = vmatmul.mubr.msk.bf16.vlgmr.msra.gmra.mrb[4].mxu1 %vm748_vm2, %v670_v12  ;;  %v3241_v19 = vpop.f32.mrb[3].mxu1 }
 0x1d6   : > { %3263 = vmatpush3.bf16.msra.mxu1 %v3673_v1  ;;  %3264 = vmatprep.mubr.msk.bf16.mxu1 %vm4093_vm0, %v4092_v0 }
 0x1d7   : > { %3279 = vmatpush3.bf16.msra.mxu0 %v3673_v1  ;;  %3280 = vmatprep.mubr.msk.bf16.mxu0 %vm4093_vm0, %v4092_v0 }
 0x1d8   : > { %3268 = vmatprep.subr.bf16.mxu1 %v4092_v0  ;;  %3294 = vmatprep.subr.bf16.mxu0 %v4092_v0 }
 0x1dd   : > { %3265 = vmatmul.mubr.msk.bf16.vlgmr.msra.gmra.mrb[8].mxu1 %vm626_vm1, %v854_v20  ;;  %3281 = vmatmul.mubr.msk.bf16.vlgmr.msra.gmra.mrb[8].mxu0 %vm626_vm1, %v969_v21  ;;  %v1344_v20 = vld [vmem:[#allocation8 + $0x4] sm:$0x3]  ;;  %v1467_v21 = vld [vmem:[#allocation8 + $0x6] sm:$0x3] }
 0x1de   : > { %3269 = vmatpush3.bf16.msra.mxu1 %v3680_v22  ;;  %3274 = vmatprep.mubr.msk.bf16.mxu1 %vm4093_vm0, %v4092_v0  ;;  %v3694_v22 = vld [vmem:[%s4847_s5 + $0x40] sm:$0xff]  }
 0x1df   : > { %3270 = vmatprep.subr.bf16.mxu1 %v4092_v0  ;;  %3296 = vmatprep.mubr.msk.bf16.mxu0 %vm4093_vm0, %v4092_v0 }
 0x1e2   : > { %3271 = vmatpush3.bf16.msra.mxu1 %v3681_v23  ;;  %v3695_v23 = vld [vmem:[%s4847_s5 + $0x48] sm:$0xff]  }
 0x1e3   : > { %3272 = vmatprep.subr.bf16.mxu1 %v4092_v0 }
 0x1e6   : > { %3273 = vmatpush3.bf16.msra.mxu1 %v3682_v24  ;;  %v3696_v24 = vld [vmem:[%s4847_s5 + $0x50] sm:$0xff]  }
 0x1e7   : > { %3284 = vmatprep.subr.bf16.mxu1 %v4092_v0 }
 0x2a8   : > { %v786_v25 = vpop.f32.mrb[4].mxu0  ;;  %v847_v26 = vpop.f32.mrb[4].mxu1 }
 0x2a9   : > { %v848_v27 = vadd.f32 %v847_v26, %v786_v25  ;;  %v3260_v28 = vpop.f32.mrb[5].mxu1  ;;  %v3250_v29 = vpop.f32.mrb[5].mxu0  ;;  %v3697_v25 = vld [vmem:[%s4847_s5 + $0x60] sm:$0xff]   ;;  %v3698_v26 = vld [vmem:[%s4847_s5 + $0x58] sm:$0xff]  }
 0x2aa   : > { %v850_v30 = vpop.f32.mrb[6].mxu1  ;;  %v789_v31 = vpop.f32.mrb[6].mxu0  ;;  %v3700_v28 = vld [vmem:[%s4847_s5 + $0x70] sm:$0xff]   ;;  %v3701_v29 = vld [vmem:[%s4847_s5 + $0x78] sm:$0xff]  }
 0x2ab   : > { %v3261_v32 = vpop.f32.mrb[7].mxu1  ;;  %v3251_v33 = vpop.f32.mrb[7].mxu0 }
 0x2b0   : > { %v892_v34 = vpop.f32.mrb[8].mxu1  ;;  %v1007_v36 = vpop.f32.mrb[8].mxu0 }
 0x2b1   : > { %v898_v37 = vpack.c.bf16 %v892_v34, %v892_v34  ;;  %v3266_v38 = vpop.f32.mrb[9].mxu1  ;;  %v3282_v39 = vpop.f32.mrb[9].mxu0  ;;  %v1013_v46 = vpack.c.bf16 %v1007_v36, %v1007_v36 }
 0x2b2   : > { %v895_v40 = vpop.f32.mrb[10].mxu1  ;;  %v1010_v41 = vpop.f32.mrb[10].mxu0 }
 0x2b3   : > { %v3267_v42 = vpop.f32.mrb[11].mxu1  ;;  %3275 = vmatmul.mubr.msk.bf16.vlgmr.msra.gmra.mrb[12].mxu1 %vm748_vm2, %v898_v37  ;;  %v3283_v43 = vpop.f32.mrb[11].mxu0 }
 0x2b4   : > { %3285 = vmatpush3.bf16.msra.mxu1 %v3683_v35  ;;  %3290 = vmatprep.mubr.msk.bf16.mxu1 %vm4093_vm0, %v4092_v0 }
 0x2b5   : > { %3286 = vmatprep.subr.bf16.mxu1 %v4092_v0 }
 0x2b8   : > { %3287 = vmatpush3.bf16.msra.mxu1 %v3684_v44 }
 0x2b9   : > { %3288 = vmatprep.subr.bf16.mxu1 %v4092_v0 }
 0x2bc   : > { %3289 = vmatpush3.bf16.msra.mxu1 %v3685_v45 }
 0x2bd   : > { %3306 = vmatprep.subr.bf16.mxu1 %v4092_v0 }
 0x2bf   : > { %3291 = vmatmul.mubr.msk.bf16.vlgmr.msra.gmra.mrb[16].mxu1 %vm748_vm2, %v1013_v46 }
 0x2c0   : > { %3314 = vmatprep.mubr.msk.bf16.mxu1 %vm4093_vm0, %v4092_v0  ;;  %3307 = vmatpush3.bf16.msra.mxu1 %v3688_v47 }
 0x2c1   : > { %3308 = vmatprep.subr.bf16.mxu1 %v4092_v0 }
 0x2c4   : > { %3309 = vmatpush3.bf16.msra.mxu1 %v3690_v48 }
 0x2c5   : > { %3310 = vmatprep.subr.bf16.mxu1 %v4092_v0 }
 0x2c8   : > { %3311 = vmatpush3.bf16.msra.mxu1 %v3692_v8  ;;  %v3705_v8 = vld [vmem:[%s4850_s8 + $0x10] sm:$0xff]  }
 0x2c9   : > { %3312 = vmatprep.subr.bf16.mxu1 %v4092_v0 }
 0x2cc   : > { %3313 = vmatpush3.bf16.msra.mxu1 %v3693_v9  ;;  %v3707_v9 = vld [vmem:[%s4850_s8 + $0x18] sm:$0xff]  }
 0x2cd   : > { %3330 = vmatprep.subr.bf16.mxu1 %v4092_v0 }
 0x386   : > { %v961_v49 = vpop.f32.mrb[12].mxu1 }
 0x387   : > { %v967_v50 = vadd.f32 %v961_v49, %v848_v27  ;;  %v3276_v51 = vpop.f32.mrb[13].mxu1  ;;  %v3699_v27 = vld [vmem:[%s4847_s5 + $0x68] sm:$0xff]   ;;  %v3704_v49 = vld [vmem:[%s4850_s8 + $0x20] sm:$0xff]  }
 0x388   : > { %v964_v52 = vpop.f32.mrb[14].mxu1 }
 0x389   : > { %v3277_v53 = vpop.f32.mrb[15].mxu1 }
 0x392   : > { %v1076_v54 = vpop.f32.mrb[16].mxu1 }
 0x393   : > { %v1082_v56 = vadd.f32 %v1076_v54, %v967_v50  ;;  %v3292_v57 = vpop.f32.mrb[17].mxu1  ;;  %v3706_v50 = vld [vmem:[%s4850_s8 + $0x28] sm:$0xff]  }
 0x394   : > { %v1079_v58 = vpop.f32.mrb[18].mxu1  ;;  %v3012_v57 = vld [vmem:[#allocation10] ss:$0 sm:$0xff] }
 0x395   : > { %v1090_v59 = vadd.f32 %v2963_v55, %v1082_v56  ;;  %v3293_v60 = vpop.f32.mrb[19].mxu1 }
 0x397   : > { %vm1091_vm3 = vcmp.ge.f32.partialorder %v1090_v59, 0.0  ;;  %v1092_v61 = vmul.f32 0.01, %v1090_v59 }
 0x399   : > { %v1093_v62 = vsel %vm1091_vm3, %v1090_v59, %v1092_v61 }
 0x39a   : > { %v1094_v63 = vpack.c.bf16 %v1093_v62, %v1093_v62 }
 0x39c   : > { %v1102_v1 = vsel %vm1100_vm4, %v1094_v63, 0 }
 0x39d   : > { %3295 = vmatpush3.bf16.msra.mxu0 %v1102_v1 }
 0x39e   : > { %3300 = vmatprep.subr.bf16.mxu0 %v4092_v0 }
 0x3a0   : > { %3297 = vmatmul.mubr.msk.bf16.vlgmr.msra.gmra.mrb[12].mxu0 %vm1096_vm5, %v1095_v2 }
 0x3a1   : > { %3301 = vmatpush3.bf16.msra.mxu0 %v1102_v1  ;;  %3302 = vmatprep.mubr.msk.bf16.mxu0 %vm4093_vm0, %v4092_v0 }
 0x3a2   : > { %3318 = vmatprep.subr.bf16.mxu0 %v4092_v0 }
 0x3a8   : > { %3303 = vmatmul.mubr.msk.bf16.vlgmr.msra.gmra.mrb[16].mxu0 %vm1096_vm5, %v1154_v3 }
 0x3a9   : > { %3319 = vmatpush3.bf16.msra.mxu0 %v3686_v4  ;;  %3326 = vmatprep.mubr.msk.bf16.mxu0 %vm4093_vm0, %v4092_v0  ;;  %v1601_v4 = vld [vmem:[#allocation11] sm:$0x1] }
 0x3aa   : > { %3320 = vmatprep.subr.bf16.mxu0 %v4092_v0 }
 0x3ad   : > { %3321 = vmatpush3.bf16.msra.mxu0 %v3687_v5  ;;  %v1660_v5 = vld [vmem:[#allocation11 + $0x1] sm:$0x1] }
 0x3ae   : > { %3322 = vmatprep.subr.bf16.mxu0 %v4092_v0 }
 0x3b1   : > { %3323 = vmatpush3.bf16.msra.mxu0 %v3689_v6  ;;  %v3702_v6 = vld [vmem:[%s4850_s8] sm:$0xff]  }
 0x3b2   : > { %3324 = vmatprep.subr.bf16.mxu0 %v4092_v0 }
 0x3b5   : > { %3325 = vmatpush3.bf16.msra.mxu0 %v3691_v7  ;;  %v3703_v7 = vld [vmem:[%s4850_s8 + $0x8] sm:$0xff]  }
 0x3b6   : > { %3336 = vmatprep.subr.bf16.mxu0 %v4092_v0 }
 0x473   : > { %v1138_v10 = vpop.f32.mrb[12].mxu0 }
 0x474   : > { %v1144_v11 = vpack.c.bf16 %v1138_v10, %v1138_v10  ;;  %v3298_v12 = vpop.f32.mrb[13].mxu0  ;;  %v3708_v10 = vld [vmem:[%s4850_s8 + $0x30] sm:$0xff]  }
 0x475   : > { %v1141_v13 = vpop.f32.mrb[14].mxu0 }
 0x476   : > { %v3299_v14 = vpop.f32.mrb[15].mxu0  ;;  %3327 = vmatmul.mubr.msk.bf16.vlgmr.msra.gmra.mrb[20].mxu0 %vm1232_vm6, %v1144_v11  ;;  %v3709_v11 = vld [vmem:[%s4850_s8 + $0x38] sm:$0xff]  }
 0x477   : > { %3344 = vmatprep.mubr.msk.bf16.mxu0 %vm4093_vm0, %v4092_v0  ;;  %3337 = vmatpush3.bf16.msra.mxu0 %v3694_v22  ;;  %v1849_v22 = vld [vmem:[#allocation11 + $0x2] sm:$0x1] }
 0x478   : > { %3338 = vmatprep.subr.bf16.mxu0 %v4092_v0 }
 0x47b   : > { %v1192_v15 = vpop.f32.mrb[16].mxu0  ;;  %3339 = vmatpush3.bf16.msra.mxu0 %v3695_v23  ;;  %v1972_v23 = vld [vmem:[#allocation11 + $0x3] sm:$0x1] }
 0x47c   : > { %v1198_v16 = vpack.c.bf16 %v1192_v15, %v1192_v15  ;;  %v3304_v17 = vpop.f32.mrb[17].mxu0  ;;  %3340 = vmatprep.subr.bf16.mxu0 %v4092_v0 }
 0x47d   : > { %v1195_v18 = vpop.f32.mrb[18].mxu0 }
 0x47e   : > { %v3305_v19 = vpop.f32.mrb[19].mxu0  ;;  %3315 = vmatmul.mubr.msk.bf16.vlgmr.msra.gmra.mrb[20].mxu1 %vm1232_vm6, %v1198_v16 }
 0x47f   : > { %3331 = vmatpush3.bf16.msra.mxu1 %v1102_v1  ;;  %3332 = vmatprep.mubr.msk.bf16.mxu1 %vm4093_vm0, %v4092_v0 }
 0x480   : > { %3348 = vmatprep.subr.bf16.mxu1 %v4092_v0  ;;  %3341 = vmatpush3.bf16.msra.mxu0 %v3696_v24  ;;  %v3710_v24 = vld [vmem:[%s4850_s8 + $0x40] sm:$0xff]  }
 0x481   : > { %3342 = vmatprep.subr.bf16.mxu0 %v4092_v0 }
 0x484   : > { %3343 = vmatpush3.bf16.msra.mxu0 %v3698_v26  ;;  %v3712_v26 = vld [vmem:[%s4850_s8 + $0x50] sm:$0xff]  }
 0x485   : > { %3366 = vmatprep.subr.bf16.mxu0 %v4092_v0 }
 0x486   : > { %3333 = vmatmul.mubr.msk.bf16.vlgmr.msra.gmra.mrb[24].mxu1 %vm1096_vm5, %v1344_v20 }
 0x487   : > { %3349 = vmatpush3.bf16.msra.mxu1 %v1102_v1  ;;  %3350 = vmatprep.mubr.msk.bf16.mxu1 %vm4093_vm0, %v4092_v0 }
 0x488   : > { %3354 = vmatprep.subr.bf16.mxu1 %v4092_v0 }
 0x48e   : > { %3351 = vmatmul.mubr.msk.bf16.vlgmr.msra.gmra.mrb[28].mxu1 %vm1096_vm5, %v1467_v21 }
 0x48f   : > { %3362 = vmatprep.mubr.msk.bf16.mxu1 %vm4093_vm0, %v4092_v0  ;;  %3355 = vmatpush3.bf16.msra.mxu1 %v3697_v25  ;;  %v3711_v25 = vld [vmem:[%s4850_s8 + $0x48] sm:$0xff]  }
 0x490   : > { %3356 = vmatprep.subr.bf16.mxu1 %v4092_v0 }
 0x493   : > { %3357 = vmatpush3.bf16.msra.mxu1 %v3699_v27  ;;  %v3713_v27 = vld [vmem:[%s4850_s8 + $0x60] sm:$0xff]  }
 0x494   : > { %3358 = vmatprep.subr.bf16.mxu1 %v4092_v0 }
 0x497   : > { %3359 = vmatpush3.bf16.msra.mxu1 %v3700_v28  ;;  %v3714_v28 = vld [vmem:[%s4850_s8 + $0x58] sm:$0xff]  }
 0x498   : > { %3360 = vmatprep.subr.bf16.mxu1 %v4092_v0 }
 0x49b   : > { %3361 = vmatpush3.bf16.msra.mxu1 %v3701_v29  ;;  %v3715_v29 = vld [vmem:[%s4850_s8 + $0x68] sm:$0xff]  }
 0x49c   : > { %3378 = vmatprep.subr.bf16.mxu1 %v4092_v0 }
 0x549   : > { %v1337_v30 = vpop.f32.mrb[20].mxu0 }
 0x54a   : > { %v3328_v31 = vpop.f32.mrb[21].mxu0 }
 0x54b   : > { %v1340_v32 = vpop.f32.mrb[22].mxu0  ;;  %v3717_v31 = vld [vmem:[%s4850_s8 + $0x78] sm:$0xff]  }
 0x54c   : > { %v3329_v33 = vpop.f32.mrb[23].mxu0 }
 0x551   : > { %v1270_v34 = vpop.f32.mrb[20].mxu1 }
 0x552   : > { %v1338_v35 = vadd.f32 %v1337_v30, %v1270_v34  ;;  %v3316_v36 = vpop.f32.mrb[21].mxu1  ;;  %v3716_v30 = vld [vmem:[%s4850_s8 + $0x70] sm:$0xff]  }
 0x553   : > { %v1273_v37 = vpop.f32.mrb[22].mxu1 }
 0x554   : > { %v3317_v38 = vpop.f32.mrb[23].mxu1 }
 0x559   : > { %v1382_v39 = vpop.f32.mrb[24].mxu1 }
 0x55a   : > { %v1388_v40 = vpack.c.bf16 %v1382_v39, %v1382_v39  ;;  %v3334_v41 = vpop.f32.mrb[25].mxu1 }
 0x55b   : > { %v1385_v42 = vpop.f32.mrb[26].mxu1 }
 0x55c   : > { %v3335_v43 = vpop.f32.mrb[27].mxu1  ;;  %3345 = vmatmul.mubr.msk.bf16.vlgmr.msra.gmra.mrb[24].mxu0 %vm1232_vm6, %v1388_v40 }
 0x55d   : > { %3368 = vmatprep.mubr.msk.bf16.mxu0 %vm4093_vm0, %v4092_v0 }
 0x561   : > { %v1505_v44 = vpop.f32.mrb[28].mxu1 }
 0x562   : > { %v1511_v45 = vpack.c.bf16 %v1505_v44, %v1505_v44  ;;  %v3352_v46 = vpop.f32.mrb[29].mxu1 }
 0x563   : > { %v1508_v47 = vpop.f32.mrb[30].mxu1 }
 0x564   : > { %v3353_v48 = vpop.f32.mrb[31].mxu1  ;;  %3363 = vmatmul.mubr.msk.bf16.vlgmr.msra.gmra.mrb[32].mxu1 %vm1232_vm6, %v1511_v45 }
 0x565   : > { %3386 = vmatprep.mubr.msk.bf16.mxu1 %vm4093_vm0, %v4092_v0  ;;  %3379 = vmatpush3.bf16.msra.mxu1 %v3704_v49 }
 0x566   : > { %3380 = vmatprep.subr.bf16.mxu1 %v4092_v0 }
 0x569   : > { %3381 = vmatpush3.bf16.msra.mxu1 %v3706_v50 }
 0x56a   : > { %3382 = vmatprep.subr.bf16.mxu1 %v4092_v0 }
 0x56d   : > { %3383 = vmatpush3.bf16.msra.mxu1 %v3708_v10  ;;  %v3097_v10 = vld [vmem:[%s4912_s23 + $0x1] sm:$0x1] }
 0x56e   : > { %3384 = vmatprep.subr.bf16.mxu1 %v4092_v0 }
 0x571   : > { %3385 = vmatpush3.bf16.msra.mxu1 %v3709_v11  ;;  %v3720_v11 = vld [vmem:[%s4853_s11 + $0x30] sm:$0xff]  }
 0x572   : > { %3402 = vmatprep.subr.bf16.mxu1 %v4092_v0 }
 0x62f   : > { %v1459_v51 = vpop.f32.mrb[24].mxu0 }
 0x630   : > { %v1465_v52 = vadd.f32 %v1459_v51, %v1338_v35  ;;  %v3346_v53 = vpop.f32.mrb[25].mxu0  ;;  %v3718_v51 = vld [vmem:[%s4853_s11 + $0x20] sm:$0xff]  }
 0x631   : > { %v1462_v54 = vpop.f32.mrb[26].mxu0 }
 0x632   : > { %v3347_v55 = vpop.f32.mrb[27].mxu0 }
 0x637   : > { %v1582_v56 = vpop.f32.mrb[32].mxu1 }
 0x638   : > { %v1588_v58 = vadd.f32 %v1582_v56, %v1465_v52  ;;  %v3364_v59 = vpop.f32.mrb[33].mxu1  ;;  %v3719_v52 = vld [vmem:[%s4853_s11 + $0x28] sm:$0xff]  }
 0x639   : > { %v1585_v60 = vpop.f32.mrb[34].mxu1  ;;  %v3061_v59 = vld [vmem:[%s4851_s9] ss:$0 sm:$0xff] }
 0x63a   : > { %v1596_v61 = vadd.f32 %v3012_v57, %v1588_v58  ;;  %v3365_v62 = vpop.f32.mrb[35].mxu1 }
 0x63c   : > { %vm1597_vm7 = vcmp.ge.f32.partialorder %v1596_v61, 0.0  ;;  %v1598_v63 = vmul.f32 0.01, %v1596_v61 }
 0x63e   : > { %v1599_v1 = vsel %vm1597_vm7, %v1596_v61, %v1598_v63 }
 0x63f   : > { %v1600_v2 = vpack.c.bf16 %v1599_v1, %v1599_v1 }
 0x641   : > { %v1608_v3 = vsel %vm1606_vm8, %v1600_v2, 0 }
 0x642   : > { %3367 = vmatpush3.bf16.msra.mxu0 %v1608_v3 }
 0x643   : > { %3372 = vmatprep.subr.bf16.mxu0 %v4092_v0 }
 0x645   : > { %3369 = vmatmul.mubr.msk.bf16.vlgmr.msra.gmra.mrb[28].mxu0 %vm1602_vm9, %v1601_v4 }
 0x646   : > { %3373 = vmatpush3.bf16.msra.mxu0 %v1608_v3  ;;  %3374 = vmatprep.mubr.msk.bf16.mxu0 %vm4093_vm0, %v4092_v0 }
 0x647   : > { %3390 = vmatprep.subr.bf16.mxu0 %v4092_v0 }
 0x64d   : > { %3375 = vmatmul.mubr.msk.bf16.vlgmr.msra.gmra.mrb[32].mxu0 %vm1602_vm9, %v1660_v5 }
 0x64e   : > { %3391 = vmatpush3.bf16.msra.mxu0 %v3702_v6  ;;  %3398 = vmatprep.mubr.msk.bf16.mxu0 %vm4093_vm0, %v4092_v0  ;;  %v2106_v6 = vld [vmem:[#allocation13] sm:$0x1] }
 0x64f   : > { %3392 = vmatprep.subr.bf16.mxu0 %v4092_v0 }
 0x652   : > { %3393 = vmatpush3.bf16.msra.mxu0 %v3703_v7  ;;  %v2165_v7 = vld [vmem:[#allocation13 + $0x1] sm:$0x1] }
 0x653   : > { %3394 = vmatprep.subr.bf16.mxu0 %v4092_v0 }
 0x656   : > { %3395 = vmatpush3.bf16.msra.mxu0 %v3705_v8  ;;  %v2354_v8 = vld [vmem:[#allocation13 + $0x2] sm:$0x1] }
 0x657   : > { %3396 = vmatprep.subr.bf16.mxu0 %v4092_v0 }
 0x65a   : > { %3397 = vmatpush3.bf16.msra.mxu0 %v3707_v9  ;;  %v2478_v9 = vld [vmem:[%s4912_s23] sm:$0x1] }
 0x65b   : > { %3408 = vmatprep.subr.bf16.mxu0 %v4092_v0 }
 0x718   : > { %v1644_v12 = vpop.f32.mrb[28].mxu0 }
 0x719   : > { %v1650_v13 = vpack.c.bf16 %v1644_v12, %v1644_v12  ;;  %v3370_v14 = vpop.f32.mrb[29].mxu0  ;;  %v3721_v12 = vld [vmem:[%s4853_s11 + $0x38] sm:$0xff]  }
 0x71a   : > { %v1647_v15 = vpop.f32.mrb[30].mxu0  ;;  %v3727_v14 = vld [vmem:[#allocation14 + $0x28] sm:$0xff]  }
 0x71b   : > { %v3371_v16 = vpop.f32.mrb[31].mxu0  ;;  %3399 = vmatmul.mubr.msk.bf16.vlgmr.msra.gmra.mrb[36].mxu0 %vm1232_vm6, %v1650_v13  ;;  %v3725_v13 = vld [vmem:[#allocation14 + $0x20] sm:$0xff]   ;;  %v3729_v15 = vld [vmem:[#allocation14 + $0x30] sm:$0xff]  }
 0x71c   : > { %3416 = vmatprep.mubr.msk.bf16.mxu0 %vm4093_vm0, %v4092_v0  ;;  %3409 = vmatpush3.bf16.msra.mxu0 %v3710_v24  ;;  %v3731_v16 = vld [vmem:[#allocation14 + $0x38] sm:$0xff]  }
 0x71d   : > { %3410 = vmatprep.subr.bf16.mxu0 %v4092_v0 }
 0x720   : > { %v1698_v17 = vpop.f32.mrb[32].mxu0  ;;  %3411 = vmatpush3.bf16.msra.mxu0 %v3711_v25 }
 0x721   : > { %v1704_v18 = vpack.c.bf16 %v1698_v17, %v1698_v17  ;;  %v3376_v19 = vpop.f32.mrb[33].mxu0  ;;  %3412 = vmatprep.subr.bf16.mxu0 %v4092_v0 }
 0x722   : > { %v1701_v20 = vpop.f32.mrb[34].mxu0 }
 0x723   : > { %v3377_v21 = vpop.f32.mrb[35].mxu0  ;;  %3387 = vmatmul.mubr.msk.bf16.vlgmr.msra.gmra.mrb[36].mxu1 %vm1232_vm6, %v1704_v18 }
 0x724   : > { %3403 = vmatpush3.bf16.msra.mxu1 %v1608_v3  ;;  %3404 = vmatprep.mubr.msk.bf16.mxu1 %vm4093_vm0, %v4092_v0 }
 0x725   : > { %3420 = vmatprep.subr.bf16.mxu1 %v4092_v0  ;;  %3413 = vmatpush3.bf16.msra.mxu0 %v3712_v26 }
 0x726   : > { %3414 = vmatprep.subr.bf16.mxu0 %v4092_v0 }
 0x729   : > { %3415 = vmatpush3.bf16.msra.mxu0 %v3714_v28 }
 0x72a   : > { %3438 = vmatprep.subr.bf16.mxu0 %v4092_v0 }
 0x72b   : > { %3405 = vmatmul.mubr.msk.bf16.vlgmr.msra.gmra.mrb[40].mxu1 %vm1602_vm9, %v1849_v22  ;;  %v3722_v22 = vld [vmem:[%s4853_s11] sm:$0xff]  }
 0x72c   : > { %3421 = vmatpush3.bf16.msra.mxu1 %v1608_v3  ;;  %3422 = vmatprep.mubr.msk.bf16.mxu1 %vm4093_vm0, %v4092_v0 }
 0x72d   : > { %3426 = vmatprep.subr.bf16.mxu1 %v4092_v0 }
 0x733   : > { %3423 = vmatmul.mubr.msk.bf16.vlgmr.msra.gmra.mrb[44].mxu1 %vm1602_vm9, %v1972_v23 }
 0x734   : > { %3434 = vmatprep.mubr.msk.bf16.mxu1 %vm4093_vm0, %v4092_v0  ;;  %3427 = vmatpush3.bf16.msra.mxu1 %v3713_v27  ;;  %v3723_v27 = vld [vmem:[%s4853_s11 + $0x8] sm:$0xff]  }
 0x735   : > { %3428 = vmatprep.subr.bf16.mxu1 %v4092_v0 }
 0x738   : > { %3429 = vmatpush3.bf16.msra.mxu1 %v3715_v29  ;;  %v3724_v29 = vld [vmem:[%s4853_s11 + $0x10] sm:$0xff]  }
 0x739   : > { %3430 = vmatprep.subr.bf16.mxu1 %v4092_v0 }
 0x73c   : > { %3431 = vmatpush3.bf16.msra.mxu1 %v3716_v30 }
 0x73d   : > { %3432 = vmatprep.subr.bf16.mxu1 %v4092_v0 }
 0x740   : > { %3433 = vmatpush3.bf16.msra.mxu1 %v3717_v31 }
 0x741   : > { %3450 = vmatprep.subr.bf16.mxu1 %v4092_v0 }
 0x7ee   : > { %v1842_v32 = vpop.f32.mrb[36].mxu0 }
 0x7ef   : > { %v3400_v33 = vpop.f32.mrb[37].mxu0 }
 0x7f0   : > { %v1845_v34 = vpop.f32.mrb[38].mxu0  ;;  %v3726_v33 = vld [vmem:[%s4853_s11 + $0x18] sm:$0xff]  }
 0x7f1   : > { %v3401_v35 = vpop.f32.mrb[39].mxu0 }
 0x7f2   : > { %v3728_v35 = vld [vmem:[%s4853_s11 + $0x40] sm:$0xff]  }
 0x7f6   : > { %v1775_v36 = vpop.f32.mrb[36].mxu1 }
 0x7f7   : > { %v1843_v37 = vadd.f32 %v1842_v32, %v1775_v36  ;;  %v3388_v38 = vpop.f32.mrb[37].mxu1 }
 0x7f8   : > { %v1778_v39 = vpop.f32.mrb[38].mxu1 }
 0x7f9   : > { %v3389_v40 = vpop.f32.mrb[39].mxu1 }
 0x7fa   : > { %v3730_v40 = vld [vmem:[%s4853_s11 + $0x48] sm:$0xff]  }
 0x7fe   : > { %v1887_v41 = vpop.f32.mrb[40].mxu1 }
 0x7ff   : > { %v1893_v42 = vpack.c.bf16 %v1887_v41, %v1887_v41  ;;  %v3406_v43 = vpop.f32.mrb[41].mxu1 }
 0x800   : > { %v1890_v44 = vpop.f32.mrb[42].mxu1  ;;  %v3733_v43 = vld [vmem:[#allocation14] sm:$0xff]  }
 0x801   : > { %v3407_v45 = vpop.f32.mrb[43].mxu1  ;;  %3417 = vmatmul.mubr.msk.bf16.vlgmr.msra.gmra.mrb[40].mxu0 %vm1232_vm6, %v1893_v42  ;;  %v3732_v42 = vld [vmem:[%s4853_s11 + $0x50] sm:$0xff]  }
 0x802   : > { %3440 = vmatprep.mubr.msk.bf16.mxu0 %vm4093_vm0, %v4092_v0 }
 0x806   : > { %v2010_v46 = vpop.f32.mrb[44].mxu1 }
 0x807   : > { %v2016_v47 = vpack.c.bf16 %v2010_v46, %v2010_v46  ;;  %v3424_v48 = vpop.f32.mrb[45].mxu1 }
 0x808   : > { %v2013_v49 = vpop.f32.mrb[46].mxu1  ;;  %v3734_v48 = vld [vmem:[%s4853_s11 + $0x58] sm:$0xff]  }
 0x809   : > { %v3425_v50 = vpop.f32.mrb[47].mxu1  ;;  %3435 = vmatmul.mubr.msk.bf16.vlgmr.msra.gmra.mrb[48].mxu1 %vm1232_vm6, %v2016_v47  ;;  %v3735_v49 = vld [vmem:[#allocation14 + $0x8] sm:$0xff]  }
 0x80a   : > { %3458 = vmatprep.mubr.msk.bf16.mxu1 %vm4093_vm0, %v4092_v0  ;;  %3451 = vmatpush3.bf16.msra.mxu1 %v3718_v51  ;;  %v3736_v50 = vld [vmem:[#allocation14 + $0x10] sm:$0xff]  }
 0x80b   : > { %3452 = vmatprep.subr.bf16.mxu1 %v4092_v0 }
 0x80e   : > { %3453 = vmatpush3.bf16.msra.mxu1 %v3719_v52  ;;  %v3737_v52 = vld [vmem:[#allocation14 + $0x18] sm:$0xff]  }
 0x80f   : > { %3454 = vmatprep.subr.bf16.mxu1 %v4092_v0 }
 0x812   : > { %3455 = vmatpush3.bf16.msra.mxu1 %v3720_v11 }
 0x813   : > { %3456 = vmatprep.subr.bf16.mxu1 %v4092_v0 }
 0x816   : > { %3457 = vmatpush3.bf16.msra.mxu1 %v3721_v12 }
 0x817   : > { %3462 = vmatprep.subr.bf16.mxu1 %v4092_v0 }
 0x8d4   : > { %v1964_v53 = vpop.f32.mrb[40].mxu0 }
 0x8d5   : > { %v1970_v54 = vadd.f32 %v1964_v53, %v1843_v37  ;;  %v3418_v55 = vpop.f32.mrb[41].mxu0 }
 0x8d6   : > { %v1967_v56 = vpop.f32.mrb[42].mxu0 }
 0x8d7   : > { %v3419_v57 = vpop.f32.mrb[43].mxu0 }
 0x8dc   : > { %v2087_v58 = vpop.f32.mrb[48].mxu1 }
 0x8dd   : > { %v2093_v60 = vadd.f32 %v2087_v58, %v1970_v54  ;;  %v3436_v61 = vpop.f32.mrb[49].mxu1 }
 0x8de   : > { %v2090_v62 = vpop.f32.mrb[50].mxu1 }
 0x8df   : > { %v2101_v63 = vadd.f32 %v3061_v59, %v2093_v60  ;;  %v3437_v1 = vpop.f32.mrb[51].mxu1 }
 0x8e1   : > { %vm2102_vm10 = vcmp.ge.f32.partialorder %v2101_v63, 0.0  ;;  %v2103_v2 = vmul.f32 0.01, %v2101_v63 }
 0x8e3   : > { %v2104_v3 = vsel %vm2102_vm10, %v2101_v63, %v2103_v2 }
 0x8e4   : > { %v2105_v4 = vpack.c.bf16 %v2104_v3, %v2104_v3 }
 0x8e6   : > { %v2113_v5 = vsel %vm2111_vm11, %v2105_v4, 0 }
 0x8e7   : > { %3439 = vmatpush3.bf16.msra.mxu0 %v2113_v5 }
 0x8e8   : > { %3444 = vmatprep.subr.bf16.mxu0 %v4092_v0 }
 0x8ea   : > { %3441 = vmatmul.mubr.msk.bf16.vlgmr.msra.gmra.mrb[44].mxu0 %vm2107_vm12, %v2106_v6 }
 0x8eb   : > { %3445 = vmatpush3.bf16.msra.mxu0 %v2113_v5  ;;  %3446 = vmatprep.mubr.msk.bf16.mxu0 %vm4093_vm0, %v4092_v0 }
 0x8ec   : > { %3474 = vmatprep.subr.bf16.mxu0 %v4092_v0 }
 0x8f2   : > { %3447 = vmatmul.mubr.msk.bf16.vlgmr.msra.gmra.mrb[48].mxu0 %vm2107_vm12, %v2165_v7 }
 0x8f3   : > { %3475 = vmatpush3.bf16.msra.mxu0 %v2113_v5  ;;  %3476 = vmatprep.mubr.msk.bf16.mxu0 %vm4093_vm0, %v4092_v0 }
 0x8f4   : > { %3492 = vmatprep.subr.bf16.mxu0 %v4092_v0 }
 0x8fa   : > { %3477 = vmatmul.mubr.msk.bf16.vlgmr.msra.gmra.mrb[52].mxu0 %vm2107_vm12, %v2354_v8 }
 0x8fb   : > { %3493 = vmatpush3.bf16.msra.mxu0 %v2113_v5  ;;  %3494 = vmatprep.mubr.msk.bf16.mxu0 %vm4093_vm0, %v4092_v0 }
 0x8fc   : > { %3498 = vmatprep.subr.bf16.mxu0 %v4092_v0 }
 0x902   : > { %3495 = vmatmul.mubr.msk.bf16.vlgmr.msra.gmra.mrb[56].mxu0 %vm2107_vm12, %v2478_v9 }
 0x903   : > { %3499 = vmatpush3.bf16.msra.mxu0 %v2113_v5  ;;  %3500 = vmatprep.mubr.msk.bf16.mxu0 %vm4093_vm0, %v4092_v0 }
 0x904   : > { %3504 = vmatprep.subr.bf16.mxu0 %v4092_v0 }
 0x90a   : > { %3501 = vmatmul.mubr.msk.bf16.vlgmr.msra.gmra.mrb[60].mxu0 %vm2107_vm12, %v3097_v10 }
 0x90b   : > { %3512 = vmatprep.mubr.msk.bf16.mxu0 %vm4093_vm0, %v4092_v0  ;;  %3505 = vmatpush3.bf16.msra.mxu0 %v3725_v13 }
 0x90c   : > { %3506 = vmatprep.subr.bf16.mxu0 %v4092_v0 }
 0x90f   : > { %3507 = vmatpush3.bf16.msra.mxu0 %v3727_v14 }
 0x910   : > { %3508 = vmatprep.subr.bf16.mxu0 %v4092_v0 }
 0x913   : > { %3509 = vmatpush3.bf16.msra.mxu0 %v3729_v15 }
 0x914   : > { %3510 = vmatprep.subr.bf16.mxu0 %v4092_v0 }
 0x917   : > { %3511 = vmatpush3.bf16.msra.mxu0 %v3731_v16 }
 0x918   : > { %3516 = vmatprep.subr.bf16.mxu0 %v4092_v0 }
 0x9bd   : > { %v2149_v17 = vpop.f32.mrb[44].mxu0 }
 0x9be   : > { %v3442_v18 = vpop.f32.mrb[45].mxu0  ;;  %v2155_v36 = vpack.c.bf16 %v2149_v17, %v2149_v17 }
 0x9bf   : > { %v2152_v19 = vpop.f32.mrb[46].mxu0 }
 0x9c0   : > { %v3443_v20 = vpop.f32.mrb[47].mxu0 }
 0x9c5   : > { %v2203_v21 = vpop.f32.mrb[48].mxu0 }
 0x9c6   : > { %v2209_v23 = vpack.c.bf16 %v2203_v21, %v2203_v21  ;;  %v3448_v24 = vpop.f32.mrb[49].mxu0 }
 0x9c7   : > { %v2206_v25 = vpop.f32.mrb[50].mxu0 }
 0x9c8   : > { %3459 = vmatmul.mubr.msk.bf16.vlgmr.msra.gmra.mrb[52].mxu1 %vm1232_vm6, %v2209_v23  ;;  %v3449_v26 = vpop.f32.mrb[51].mxu0 }
 0x9c9   : > { %3463 = vmatpush3.bf16.msra.mxu1 %v3722_v22  ;;  %3470 = vmatprep.mubr.msk.bf16.mxu1 %vm4093_vm0, %v4092_v0 }
 0x9ca   : > { %3464 = vmatprep.subr.bf16.mxu1 %v4092_v0 }
 0x9cd   : > { %3465 = vmatpush3.bf16.msra.mxu1 %v3723_v27  ;;  %v2392_v28 = vpop.f32.mrb[52].mxu0 }
 0x9ce   : > { %3466 = vmatprep.subr.bf16.mxu1 %v4092_v0  ;;  %v3478_v30 = vpop.f32.mrb[53].mxu0  ;;  %v2398_v51 = vpack.c.bf16 %v2392_v28, %v2392_v28 }
 0x9cf   : > { %v2395_v31 = vpop.f32.mrb[54].mxu0 }
 0x9d0   : > { %v3479_v32 = vpop.f32.mrb[55].mxu0 }
 0x9d1   : > { %3467 = vmatpush3.bf16.msra.mxu1 %v3724_v29 }
 0x9d2   : > { %3468 = vmatprep.subr.bf16.mxu1 %v4092_v0 }
 0x9d5   : > { %3469 = vmatpush3.bf16.msra.mxu1 %v3726_v33  ;;  %v2516_v34 = vpop.f32.mrb[56].mxu0 }
 0x9d6   : > { %3480 = vmatprep.subr.bf16.mxu1 %v4092_v0  ;;  %v3496_v37 = vpop.f32.mrb[57].mxu0  ;;  %v2522_v53 = vpack.c.bf16 %v2516_v34, %v2516_v34 }
 0x9d7   : > { %v2519_v38 = vpop.f32.mrb[58].mxu0 }
 0x9d8   : > { %3471 = vmatmul.mubr.msk.bf16.vlgmr.msra.gmra.mrb[52].mxu1 %vm1232_vm6, %v2155_v36  ;;  %v3497_v39 = vpop.f32.mrb[59].mxu0 }
 0x9d9   : > { %3481 = vmatpush3.bf16.msra.mxu1 %v3728_v35  ;;  %3488 = vmatprep.mubr.msk.bf16.mxu1 %vm4093_vm0, %v4092_v0 }
 0x9da   : > { %3482 = vmatprep.subr.bf16.mxu1 %v4092_v0 }
 0x9dd   : > { %3483 = vmatpush3.bf16.msra.mxu1 %v3730_v40  ;;  %v2570_v41 = vpop.f32.mrb[60].mxu0 }
 0x9de   : > { %v2576_v44 = vpack.c.bf16 %v2570_v41, %v2570_v41  ;;  %3484 = vmatprep.subr.bf16.mxu1 %v4092_v0  ;;  %v3502_v45 = vpop.f32.mrb[61].mxu0 }
 0x9df   : > { %v2573_v46 = vpop.f32.mrb[62].mxu0 }
 0x9e0   : > { %3513 = vmatmul.mubr.msk.bf16.vlgmr.msra.gmra.mrb[64].mxu0 %vm1232_vm6, %v2576_v44  ;;  %v3503_v47 = vpop.f32.mrb[63].mxu0 }
 0x9e1   : > { %3485 = vmatpush3.bf16.msra.mxu1 %v3732_v42  ;;  %3517 = vmatpush3.bf16.msra.mxu0 %v3733_v43 }
 0x9e2   : > { %3486 = vmatprep.subr.bf16.mxu1 %v4092_v0  ;;  %3518 = vmatprep.subr.bf16.mxu0 %v4092_v0 }
 0x9e3   : > { %3524 = vmatprep.mubr.msk.bf16.mxu0 %vm4093_vm0, %v4092_v0 }
 0x9e5   : > { %3487 = vmatpush3.bf16.msra.mxu1 %v3734_v48  ;;  %3519 = vmatpush3.bf16.msra.mxu0 %v3735_v49 }
 0x9e6   : > { %3520 = vmatprep.subr.bf16.mxu0 %v4092_v0 }
 0x9e8   : > { %3489 = vmatmul.mubr.msk.bf16.vlgmr.msra.gmra.mrb[52].mxu1 %vm1232_vm6, %v2398_v51 }
 0x9e9   : > { %3521 = vmatpush3.bf16.msra.mxu0 %v3736_v50 }
 0x9ea   : > { %3522 = vmatprep.subr.bf16.mxu0 %v4092_v0 }
 0x9ed   : > { %3523 = vmatpush3.bf16.msra.mxu0 %v3737_v52 }
 0x9f0   : > { %3525 = vmatmul.mubr.msk.bf16.vlgmr.msra.gmra.mrb[64].mxu0 %vm1232_vm6, %v2522_v53 }
 0xabb   : > { %v2469_v0 = vpop.f32.mrb[52].mxu1 }
 0xabc   : > { %2477 = vst.msk [vmem:[%s604_s24] sm:$0x3] %vm2476_vm13, %v2469_v0  ;;  %v3490_v54 = vpop.f32.mrb[53].mxu1 }
 0xabd   : > { %v2472_v55 = vpop.f32.mrb[54].mxu1 }
 0xabe   : > { %3975 = shalt.err (!%p3972_p13)
}
 0xabf   : > { %s3976_s27 = scalar_lea.hbm %s4768_s14, 32  ;;  %s3980_s17 = scalar_lea.hbm %s4915_s28, 64 }
 0xac0   : > { %p3977_p12 = scmp.ne.s32.totalorder %s4768_s14, %s3976_s27  ;;  %p3981_p3 = scmp.lt.u32.totalorder %s4768_s14, %s4915_s28 }
 0xac1   : > { %p3982_p4 = scmp.lt.u32.totalorder %s3980_s17, %s3976_s27  ;;  %p3984_p8 = scmp.lt.u32.totalorder %s3976_s27, %s4768_s14 }
 0xac2   : > { %p3978_p1 = pnand %p3977_p12, %p4916_p11 }
 0xac3   : > { %p3983_p7 = por %p3982_p4, %p3981_p3 }
 0xac4   : > { %p3979_p2 = pneg %p3978_p1 }
 0xac5   : > { %p3985_p5 = por %p3984_p8, %p3983_p7 }
 0xac7   : > { %p3986_p0 = pnand %p3985_p5, %p3979_p2 }
 0xac9   : > { %3989 = shalt.err (!%p3986_p0)
}
 0xaca   : > { %3572 = dma.vmem_to_hbm [thread:$0]  (%p4916_p11), %s4770_s19, 32, %s4768_s14, %s2723_s25   ;;  %v3491_v56 = vpop.f32.mrb[55].mxu1  ;;  %vm2720_vm14 = vcmask 32768   ;;  %v2714_v57 = vpop.f32.mrb[64].mxu0 }
 0xacb   : > { %s3111_s4 = sshll.u32 %s4197_s22, 4  ;;  %s610_s21 = scalar_lea.vmem [#allocation17], %s4761_s20  ;;  %v3526_v58 = vpop.f32.mrb[65].mxu0 }
 0xacc   : > { %s2753_s12 = sshll.u32 %s610_s21, 4  ;;  %s4917_s2 = sld [smem:[#allocation38_spill]]  ;;  %2721 = vst.msk [vmem:[%s610_s21] sm:$0x1] %vm2720_vm14, %v2714_v57  ;;  %v2717_v59 = vpop.f32.mrb[66].mxu0  ;;  %s4801_s12 = int_to_ptr.vmem [resolvable:$true] %s2753_s12 }
 0xacd   : > { %s2728_s19 = scalar_lea.sflag [#allocation18], %s4761_s20  ;;  %s3990_s14 = scalar_lea.vmem %s4801_s12, 16 }
 0xace   : > { %p3991_p6 = scmp.ne.s32.totalorder %s4801_s12, %s3990_s14  ;;  %s4095_s22 = smov [#allocation17]  }
 0xacf   : > { %s3994_s25 = sshll.u32 %s4095_s22, 4  ;;  %s3995_s25 = int_to_ptr.vmem [resolvable:$false] %s3994_s25 }
 0xad0   : > { %p3992_p9 = pnand %p3991_p6, %p4916_p11  ;;  %s3996_s15 = scalar_lea.vmem %s3995_s25, 32 }
 0xad1   : > { %p3997_p13 = scmp.lt.s32.totalorder %s4801_s12, %s3995_s25  ;;  %p3998_p12 = scmp.lt.s32.totalorder %s3996_s15, %s3990_s14 }
 0xad2   : > { %s4799_s27 = scalar_lea.hbm %s4917_s2, %s3111_s4  ;;  %p3993_p10 = pneg %p3992_p9 }
 0xad3   : > { %p3999_p1 = por %p3998_p12, %p3997_p13 }
 0xad5   : > { %p4000_p2 = pnand %p3999_p1, %p3993_p10 }
 0xad7   : > { %4003 = shalt.err (!%p4000_p2)
}
 0xad8   : > { %s4004_s20 = scalar_lea.hbm %s4799_s27, 16  ;;  %s4008_s26 = scalar_lea.hbm %s4917_s2, 32 }
 0xad9   : > { %p4005_p3 = scmp.ne.s32.totalorder %s4799_s27, %s4004_s20  ;;  %p4009_p8 = scmp.lt.u32.totalorder %s4799_s27, %s4917_s2 }
 0xada   : > { %p4010_p5 = scmp.lt.u32.totalorder %s4008_s26, %s4004_s20  ;;  %p4012_p6 = scmp.lt.u32.totalorder %s4004_s20, %s4799_s27 }
 0xadb   : > { %p4006_p4 = pnand %p4005_p3, %p4916_p11 }
 0xadc   : > { %p4011_p0 = por %p4010_p5, %p4009_p8 }
 0xadd   : > { %p4007_p7 = pneg %p4006_p4 }
 0xade   : > { %p4013_p9 = por %p4012_p6, %p4011_p0 }
 0xae0   : > { %p4014_p10 = pnand %p4013_p9, %p4007_p7 }
 0xae2   : > { %4017 = shalt.err (!%p4014_p10)
}
 0xae3   : > { %3573 = dma.vmem_to_hbm [thread:$0]  (%p4916_p11), %s4801_s12, 16, %s4799_s27, %s2728_s19   ;;  %v3527_v60 = vpop.f32.mrb[67].mxu0 }
 0xae4 PF: > { %s4918_s21 = sld [smem:[#allocation29_spill]]  ;;  %s4919_s30 = sld [smem:[#allocation26_spill]] }
 0xae5   : > { %s4920_s16 = sld [smem:[#allocation33_spill]] }
 0xaea   : > { %p3624_p13 = scmp.ge.s32.totalorder %s4918_s21, 2  ;;  %s2765_s14 = sand.u32 1, %s4919_s30  }
 0xaeb   : > { %p4921_p12 = scmp.ne.s32.totalorder %s4920_s16, 0  ;;  %s2766_s22 = scalar_lea.sflag [#allocation4], %s2765_s14 }
 0xaed   : > { %p3602_p1 = pnand %p3624_p13, %p4921_p12 }
 0xaef   : > { %4055 = dma.done.wait (!%p3602_p1), %s2766_s22, 32  }
 0xaf0   : > { %4057 = vsyncadd (!%p3602_p1), %s2766_s22, 4294967264  ;;  %s2775_s25 = scalar_lea.sflag [#allocation18], %s2765_s14 }
 0xaf1   : > { %4059 = dma.done.wait (!%p3602_p1), %s2775_s25, 16  }
 0xaf2   : > { %4061 = vsyncadd (!%p3602_p1), %s2775_s25, 4294967280  ;;  %s4922_s21 = sld [smem:[#allocation30_spill]]  ;;  %s4923_s18 = sld [smem:[#allocation27_spill]] }
 0xaf3   : > { %s4924_s19 = sld [smem:[#allocation28_spill]]  ;;  %s4925_s20 = sld [smem:[#allocation31_spill]] }
 0xaf8   : > { %p34_p11 = scmp.ge.s32.totalorder %s4922_s21, 4  }
 0xafa   :  { %36 = sbr.rel (!%p34_p11) target bundleno = 16 (0x10), region = 185 }
 0xb01   :  { %2779 = vsyncpa [#allocation3], 1 }
 0xb02   :  { %2781 = vsyncpa [#allocation3 + $0x1], 1 }
 0xb03   :  { %2782 = vsyncpa [#allocation6], 1 }
 0xb04   :  { %2783 = vsyncpa [#allocation9], 1 }
 0xb05   :  { %2784 = vsyncpa [#allocation12], 1 }
 0xb06   :  { %2785 = vsyncpa [#allocation15], 1 }
 0xb07   :  { %2786 = vsyncpa [#allocation4], 1 }
 0xb08   :  { %2788 = vsyncpa [#allocation4 + $0x1], 1 }
 0xb09   :  { %2789 = vsyncpa [#allocation18], 1 }
 0xb0a   :  { %2791 = vsyncpa [#allocation18 + $0x1], 1 }

</bundles_post_ra>
